<compile_context>
chip_gen: v5e
topology: v5e:2x2
jax: 0.10.0
libtpu: 0.0.40
codegen_flags: <defaults>
</compile_context>

<pallas_src>
import functools

import jax
import jax.numpy as jnp
from jax.experimental import pallas as pl
from jax.experimental.pallas import tpu as pltpu


HIDDEN = 8     # encoder/decoder conv channel count (inferred VAEConv width)


def _round_up(x, m):
    return (x + m - 1) // m * m


def _pad2(a, rows, cols):
    return jnp.pad(a, ((0, rows - a.shape[0]), (0, cols - a.shape[1])))


# ---------------------------------------------------------------------------
# Pallas kernels
# ---------------------------------------------------------------------------
def _conv_kernel(wt_ref, p_ref, b_ref, o_ref, *, relu):
    # One (VAE v, batch b) grid cell of a lane-dense 3x3 conv:
    #   (Cout_pad, K) bf16 @ (K, hw) bf16 -> f32, + bias, (+ReLU).
    acc = jnp.dot(wt_ref[...], p_ref[...], preferred_element_type=jnp.float32)
    acc = acc + b_ref[...]                    # (Cout_pad, 1) broadcast over lanes
    if relu:
        acc = jnp.maximum(acc, 0.0)
    o_ref[...] = acc.astype(o_ref.dtype)


def _latent_chain_kernel(hf_ref, wml_ref, bml_ref, eps_ref, wd_ref, bd_ref,
                         d_ref, stats_ref, *, lat_pad):
    # Fused: [fc_mean | fc_logvar] (one MXU pass) + reparam + decoder FC + ReLU.
    hf = hf_ref[...]                                              # (BP, flat) bf16
    ml = jnp.dot(hf, wml_ref[...], preferred_element_type=jnp.float32)
    ml = ml + bml_ref[...]                                        # (BP, 2*lat_pad)
    mean = ml[:, :lat_pad]
    logvar = ml[:, lat_pad:]
    std = jnp.exp(0.5 * logvar)          # single EUP transcendental, no overflow
    var = std * std
    z = mean + std * eps_ref[...]
    zd = z.astype(jnp.bfloat16)
    d = jnp.dot(zd, wd_ref[...], preferred_element_type=jnp.float32)
    d = jnp.maximum(d + bd_ref[...], 0.0)
    d_ref[...] = d.astype(d_ref.dtype)
    # one lane-packed stats slab instead of 4 narrow outputs
    stats_ref[...] = jnp.concatenate([z, mean, var, logvar], axis=-1
                                     ).astype(stats_ref.dtype)


# ---------------------------------------------------------------------------
# pallas_call wrappers
# ---------------------------------------------------------------------------
def conv_lane_dense(wt, p, b, hw, relu):
    """Stacked lane-dense 3x3 convs with batch-major output.

    wt: (V, Cout_pad, K)  bf16   transposed, K-padded weights
    p : (V, K, B*hw)      bf16   im2col patches, pixel columns ordered (b,h,w)
    b : (V, Cout_pad, 1)  f32
    -> (V, B, Cout_pad, hw) f32  (batch-major: downstream flatten / NCHW views
       are free reshapes; no HBM transpose round trip).
    """
    V, CP, K = wt.shape
    _, _, npix = p.shape
    B = npix // hw
    return pl.pallas_call(
        functools.partial(_conv_kernel, relu=relu),
        out_shape=jax.ShapeDtypeStruct((V, B, CP, hw), jnp.float32),
        grid=(V, B),
        in_specs=[
            pl.BlockSpec((None, CP, K), lambda v, n: (v, 0, 0)),
            pl.BlockSpec((None, K, hw), lambda v, n: (v, 0, n)),
            pl.BlockSpec((None, CP, 1), lambda v, n: (v, 0, 0)),
        ],
        out_specs=pl.BlockSpec((None, None, CP, hw), lambda v, n: (v, n, 0, 0)),
        compiler_params=pltpu.CompilerParams(
            dimension_semantics=("parallel", "parallel")),
    )(wt, p, b)


def latent_chain(hf, wml, bml, eps, wd, bd, lat_pad):
    """Fused packed mean/logvar head + reparam + decoder FC for both VAEs."""
    V, BP, flat = hf.shape
    f32 = jnp.float32
    return pl.pallas_call(
        functools.partial(_latent_chain_kernel, lat_pad=lat_pad),
        out_shape=(jax.ShapeDtypeStruct((V, BP, flat), f32),          # dec FC
                   jax.ShapeDtypeStruct((V, BP, 4 * lat_pad), f32)),  # stats slab
        grid=(V,),
        in_specs=[
            pl.BlockSpec((None, BP, flat), lambda v: (v, 0, 0)),
            pl.BlockSpec((None, flat, 2 * lat_pad), lambda v: (v, 0, 0)),
            pl.BlockSpec((None, 1, 2 * lat_pad), lambda v: (v, 0, 0)),
            pl.BlockSpec((None, BP, lat_pad), lambda v: (v, 0, 0)),
            pl.BlockSpec((None, lat_pad, flat), lambda v: (v, 0, 0)),
            pl.BlockSpec((None, 1, flat), lambda v: (v, 0, 0)),
        ],
        out_specs=(
            pl.BlockSpec((None, BP, flat), lambda v: (v, 0, 0)),
            pl.BlockSpec((None, BP, 4 * lat_pad), lambda v: (v, 0, 0)),
        ),
        compiler_params=pltpu.CompilerParams(
            dimension_semantics=("parallel",)),
    )(hf, wml, bml, eps, wd, bd)


# ---------------------------------------------------------------------------
# Glue (plain JAX): im2col, parameter packing, init, module-level forward
# ---------------------------------------------------------------------------
# TODO(synk): im2col stays XLA glue; at large B*H*W it should move in-kernel
# (halo DMA + 9 shifted dots) to avoid the 9x patch expansion through HBM.
def im2col_t_3x3(x):
    """NCHW (B,C,H,W) -> (C*9, B*H*W) patches for a 3x3, pad=1, stride=1 conv.

    Rows ordered (c, tap); columns ordered (b, h, w) -> lane-dense pixel axis.
    """
    B, C, H, W = x.shape
    xp = jnp.pad(x, ((0, 0), (0, 0), (1, 1), (1, 1)))
    cols = [xp[:, :, di:di + H, dj:dj + W] for di in range(3) for dj in range(3)]
    p = jnp.stack(cols, axis=2)            # (B, C, 9, H, W)
    p = p.transpose(1, 2, 0, 3, 4)         # (C, 9, B, H, W)
    return p.reshape(C * 9, B * H * W)


def init_vae_conv_params(key, input_dim, output_dim, latent_dim, H, W,
                         hidden=HIDDEN):
    ks = jax.random.split(key, 5)
    s = 0.05
    flat = hidden * H * W
    return dict(
        enc_conv_w=jax.random.normal(ks[0], (input_dim * 9, hidden), jnp.float32) * s,
        enc_conv_b=jnp.zeros((1, hidden), jnp.float32),
        fc_mean_w=jax.random.normal(ks[1], (flat, latent_dim), jnp.float32) * s,
        fc_mean_b=jnp.zeros((1, latent_dim), jnp.float32),
        fc_logvar_w=jax.random.normal(ks[2], (flat, latent_dim), jnp.float32) * s,
        fc_logvar_b=jnp.zeros((1, latent_dim), jnp.float32),
        dec_fc_w=jax.random.normal(ks[3], (latent_dim, flat), jnp.float32) * s,
        dec_fc_b=jnp.zeros((1, flat), jnp.float32),
        dec_conv_w=jax.random.normal(ks[4], (hidden * 9, output_dim), jnp.float32) * s,
        dec_conv_b=jnp.zeros((1, output_dim), jnp.float32),
    )


def cor_vae_conv_forward(params_x, params_y, x, y, eps_x, eps_y):
    B, cin_x, H, W = x.shape
    By, cin_y, Hy, Wy = y.shape
    assert (B, H, W) == (By, Hy, Wy)
    hidden = params_x["enc_conv_w"].shape[1]
    assert hidden == params_y["enc_conv_w"].shape[1] and hidden % 8 == 0
    lat_x = params_x["fc_mean_w"].shape[1]
    lat_y = params_y["fc_mean_w"].shape[1]
    cout_x = params_x["dec_conv_w"].shape[1]
    cout_y = params_y["dec_conv_w"].shape[1]

    hw = H * W
    npix = B * hw
    flat = hidden * hw
    # Requirement (documented): the lane-dense pixel axis needs H*W % 128 == 0.
    assert hw % 128 == 0, "H*W must be a multiple of 128"

    bf16, f32 = jnp.bfloat16, jnp.float32
    lat_pad = _round_up(max(lat_x, lat_y), 16)        # bf16 sublane padding
    cp_enc = _round_up(hidden, 8)                     # == hidden (free flatten)
    cp_dec = _round_up(max(cout_x, cout_y), 8)
    bp = _round_up(max(B, 8), 8)
    k_enc = _round_up(max(cin_x, cin_y) * 9, 16)      # 36/54 -> 64 (was 128)
    k_dec = _round_up(hidden * 9, 16)                 # 72    -> 80 (was 128)

    # ---------------- encoder convs (x & y fused in one call) -------------
    P = jnp.stack([_pad2(im2col_t_3x3(x), k_enc, npix),
                   _pad2(im2col_t_3x3(y), k_enc, npix)]).astype(bf16)
    WT = jnp.stack([_pad2(params_x["enc_conv_w"].T, cp_enc, k_enc),
                    _pad2(params_y["enc_conv_w"].T, cp_enc, k_enc)]).astype(bf16)
    Bb = jnp.stack([_pad2(params_x["enc_conv_b"].T, cp_enc, 1),
                    _pad2(params_y["enc_conv_b"].T, cp_enc, 1)]).astype(f32)
    Henc = conv_lane_dense(WT, P, Bb, hw, relu=True)     # (2, B, hidden, hw) f32

    # batch-major already -> torch flatten is a free reshape (cp_enc == hidden)
    HF = Henc.reshape(2, B, flat)
    HF = jnp.pad(HF, ((0, 0), (0, bp - B), (0, 0))).astype(bf16)

    # ---------------- fused latent chain (packed heads + reparam + FC) ----
    def head_w(p):
        return jnp.concatenate([_pad2(p["fc_mean_w"], flat, lat_pad),
                                _pad2(p["fc_logvar_w"], flat, lat_pad)], axis=1)

    def head_b(p):
        return jnp.concatenate([_pad2(p["fc_mean_b"], 1, lat_pad),
                                _pad2(p["fc_logvar_b"], 1, lat_pad)], axis=1)

    WML = jnp.stack([head_w(params_x), head_w(params_y)]).astype(bf16)
    BML = jnp.stack([head_b(params_x), head_b(params_y)]).astype(f32)
    EPS = jnp.stack([_pad2(eps_x, bp, lat_pad),
                     _pad2(eps_y, bp, lat_pad)]).astype(f32)
    WD = jnp.stack([_pad2(params_x["dec_fc_w"], lat_pad, flat),
                    _pad2(params_y["dec_fc_w"], lat_pad, flat)]).astype(bf16)
    BD = jnp.stack([params_x["dec_fc_b"], params_y["dec_fc_b"]]).astype(f32)
    D, STATS = latent_chain(HF, WML, BML, EPS, WD, BD, lat_pad)

    # ---------------- decoder convs (x & y fused in one call) -------------
    def dec_patches(d_rows):
        img = d_rows[:B].reshape(B, hidden, H, W)        # torch reshape order
        return _pad2(im2col_t_3x3(img), k_dec, npix)

    DP = jnp.stack([dec_patches(D[0]), dec_patches(D[1])]).astype(bf16)
    WTd = jnp.stack([_pad2(params_x["dec_conv_w"].T, cp_dec, k_dec),
                     _pad2(params_y["dec_conv_w"].T, cp_dec, k_dec)]).astype(bf16)
    Bd = jnp.stack([_pad2(params_x["dec_conv_b"].T, cp_dec, 1),
                    _pad2(params_y["dec_conv_b"].T, cp_dec, 1)]).astype(f32)
    O = conv_lane_dense(WTd, DP, Bd, hw, relu=False)     # (2, B, cp_dec, hw)

    out_x = O[0, :, :cout_x].reshape(B, cout_x, H, W)
    out_y = O[1, :, :cout_y].reshape(B, cout_y, H, W)

    def unpack_stats(v, lat):
        s = STATS[v, :B]
        return (s[:, 0:lat],
                s[:, lat_pad:lat_pad + lat],
                s[:, 2 * lat_pad:2 * lat_pad + lat],
                s[:, 3 * lat_pad:3 * lat_pad + lat])

    z_x, mean_x, var_x, logvar_x = unpack_stats(0, lat_x)
    z_y, mean_y, var_y, logvar_y = unpack_stats(1, lat_y)
    return (out_x, z_x, mean_x, var_x, logvar_x,
            out_y, z_y, mean_y, var_y, logvar_y)


# ---------------------------------------------------------------------------
if __name__ == "__main__":
    key = jax.random.PRNGKey(0)
    kpx, kpy, kdx, kdy, kex, key_ = jax.random.split(key, 6)

    B, H, W = 2, 16, 16
    input_dim_x, input_dim_y = 4, 6
    latent_dim_x, latent_dim_y = 8, 8

    params_x = init_vae_conv_params(kpx, input_dim_x, input_dim_x, latent_dim_x, H, W)
    params_y = init_vae_conv_params(kpy, input_dim_y, input_dim_y, latent_dim_y, H, W)

    x = jax.random.normal(kdx, (B, input_dim_x, H, W), jnp.float32)
    y = jax.random.normal(kdy, (B, input_dim_y, H, W), jnp.float32)
    eps_x = jax.random.normal(kex, (B, latent_dim_x), jnp.float32)
    eps_y = jax.random.normal(key_, (B, latent_dim_y), jnp.float32)

    fwd = jax.jit(cor_vae_conv_forward)
    outs = fwd(params_x, params_y, x, y, eps_x, eps_y)
    outs = jax.block_until_ready(outs)

    assert outs[0].shape == x.shape                  # output_x
    assert outs[1].shape == (B, latent_dim_x)        # z_x
    assert outs[2].shape == (B, latent_dim_x)        # mean_x
    assert outs[3].shape == (B, latent_dim_x)        # var_x
    assert outs[4].shape == (B, latent_dim_x)        # log_var_x
    assert outs[5].shape == y.shape                  # output_y
    assert outs[6].shape == (B, latent_dim_y)        # z_y
    assert outs[7].shape == (B, latent_dim_y)        # mean_y
    assert outs[8].shape == (B, latent_dim_y)        # var_y
    assert outs[9].shape == (B, latent_dim_y)        # log_var_y
    print("KERNEL_OK")
</pallas_src>

<mosaic_0001>
module attributes {stable_mosaic.version = 11 : i64} {
  func.func @_conv_kernel(%arg0: i32, %arg1: i32, %arg2: memref<1x8x64xbf16, #tpu.memory_space<vmem>>, %arg3: memref<1x64x256xbf16, #tpu.memory_space<vmem>>, %arg4: memref<1x8x1xf32, #tpu.memory_space<vmem>>, %arg5: memref<1x1x8x256xf32, #tpu.memory_space<vmem>>) attributes {dimension_semantics = [#tpu.dimension_semantics<parallel>, #tpu.dimension_semantics<parallel>], iteration_bounds = array<i64: 2, 2>, scalar_prefetch = 0 : i64, scratch_operands = 0 : i64, tpu.core_type = #tpu.core_type<tc>, window_params = [{transform_indices = @transform_0, window_bounds = array<i64: 1, 8, 64>}, {transform_indices = @transform_1, window_bounds = array<i64: 1, 64, 256>}, {transform_indices = @transform_2, window_bounds = array<i64: 1, 8, 1>}, {transform_indices = @transform_3, window_bounds = array<i64: 1, 1, 8, 256>}]} {
    %c0 = arith.constant 0 : index
    %c0_0 = arith.constant 0 : index
    %c0_1 = arith.constant 0 : index
    %0 = vector.load %arg2[%c0, %c0_0, %c0_1] : memref<1x8x64xbf16, #tpu.memory_space<vmem>>, vector<1x8x64xbf16>
    %1 = vector.shape_cast %0 : vector<1x8x64xbf16> to vector<8x64xbf16>
    %c0_2 = arith.constant 0 : index
    %c0_3 = arith.constant 0 : index
    %c0_4 = arith.constant 0 : index
    %2 = vector.load %arg3[%c0_2, %c0_3, %c0_4] : memref<1x64x256xbf16, #tpu.memory_space<vmem>>, vector<1x64x256xbf16>
    %3 = vector.shape_cast %2 : vector<1x64x256xbf16> to vector<64x256xbf16>
    %cst = arith.constant dense<0.000000e+00> : vector<8x256xf32>
    %4 = tpu.matmul %1, %3, %cst {dimension_numbers = #tpu.dot_dimension_numbers<[1], [0], [0], [1], [0, 0, 1, 1], [], []>} : vector<8x64xbf16>, vector<64x256xbf16>, vector<8x256xf32> -> vector<8x256xf32>
    %c0_5 = arith.constant 0 : index
    %c0_6 = arith.constant 0 : index
    %c0_7 = arith.constant 0 : index
    %5 = vector.load %arg4[%c0_5, %c0_6, %c0_7] : memref<1x8x1xf32, #tpu.memory_space<vmem>>, vector<1x8x1xf32>
    %6 = vector.shape_cast %5 : vector<1x8x1xf32> to vector<8x1xf32>
    %7 = vector.broadcast %6 : vector<8x1xf32> to vector<8x256xf32>
    %8 = arith.addf %4, %7 : vector<8x256xf32>
    %cst_8 = arith.constant 0.000000e+00 : f32
    %9 = vector.broadcast %cst_8 : f32 to vector<8x256xf32>
    %10 = arith.maximumf %8, %9 : vector<8x256xf32>
    %c0_9 = arith.constant 0 : index
    %c0_10 = arith.constant 0 : index
    %c0_11 = arith.constant 0 : index
    %c0_12 = arith.constant 0 : index
    %11 = vector.load %arg5[%c0_9, %c0_10, %c0_11, %c0_12] : memref<1x1x8x256xf32, #tpu.memory_space<vmem>>, vector<1x1x8x256xf32>
    %12 = vector.shape_cast %11 : vector<1x1x8x256xf32> to vector<8x256xf32>
    %13 = vector.shape_cast %10 : vector<8x256xf32> to vector<1x1x8x256xf32>
    tpu.vector_store %arg5[%c0_9, %c0_10, %c0_11, %c0_12], %13 {strides = array<i32>} : memref<1x1x8x256xf32, #tpu.memory_space<vmem>>, vector<1x1x8x256xf32>,
    return
  }
  func.func @transform_0(%arg0: i32, %arg1: i32) -> (i32, i32, i32) {
    %c0_i32 = arith.constant 0 : i32
    %c0_i32_0 = arith.constant 0 : i32
    %c0_i32_1 = arith.constant 0 : i32
    return %arg0, %c0_i32, %c0_i32_0 : i32, i32, i32
  }
  func.func @transform_1(%arg0: i32, %arg1: i32) -> (i32, i32, i32) {
    %c0_i32 = arith.constant 0 : i32
    %c0_i32_0 = arith.constant 0 : i32
    return %arg0, %c0_i32, %arg1 : i32, i32, i32
  }
  func.func @transform_2(%arg0: i32, %arg1: i32) -> (i32, i32, i32) {
    %c0_i32 = arith.constant 0 : i32
    %c0_i32_0 = arith.constant 0 : i32
    %c0_i32_1 = arith.constant 0 : i32
    return %arg0, %c0_i32, %c0_i32_0 : i32, i32, i32
  }
  func.func @transform_3(%arg0: i32, %arg1: i32) -> (i32, i32, i32, i32) {
    %c0_i32 = arith.constant 0 : i32
    %c0_i32_0 = arith.constant 0 : i32
    %c0_i32_1 = arith.constant 0 : i32
    return %arg0, %arg1, %c0_i32, %c0_i32_0 : i32, i32, i32, i32
  }
}

module attributes {stable_mosaic.version = 11 : i64} {
  func.func @_latent_chain_kernel(%arg0: i32, %arg1: memref<1x8x2048xbf16, #tpu.memory_space<vmem>>, %arg2: memref<1x2048x32xbf16, #tpu.memory_space<vmem>>, %arg3: memref<1x1x32xf32, #tpu.memory_space<vmem>>, %arg4: memref<1x8x16xf32, #tpu.memory_space<vmem>>, %arg5: memref<1x16x2048xbf16, #tpu.memory_space<vmem>>, %arg6: memref<1x1x2048xf32, #tpu.memory_space<vmem>>, %arg7: memref<1x8x2048xf32, #tpu.memory_space<vmem>>, %arg8: memref<1x8x64xf32, #tpu.memory_space<vmem>>) attributes {dimension_semantics = [#tpu.dimension_semantics<parallel>], iteration_bounds = array<i64: 2>, scalar_prefetch = 0 : i64, scratch_operands = 0 : i64, tpu.core_type = #tpu.core_type<tc>, window_params = [{transform_indices = @transform_0, window_bounds = array<i64: 1, 8, 2048>}, {transform_indices = @transform_1, window_bounds = array<i64: 1, 2048, 32>}, {transform_indices = @transform_2, window_bounds = array<i64: 1, 1, 32>}, {transform_indices = @transform_3, window_bounds = array<i64: 1, 8, 16>}, {transform_indices = @transform_4, window_bounds = array<i64: 1, 16, 2048>}, {transform_indices = @transform_5, window_bounds = array<i64: 1, 1, 2048>}, {transform_indices = @transform_6, window_bounds = array<i64: 1, 8, 2048>}, {transform_indices = @transform_7, window_bounds = array<i64: 1, 8, 64>}]} {
    %c0 = arith.constant 0 : index
    %c0_0 = arith.constant 0 : index
    %c0_1 = arith.constant 0 : index
    %0 = vector.load %arg1[%c0, %c0_0, %c0_1] : memref<1x8x2048xbf16, #tpu.memory_space<vmem>>, vector<1x8x2048xbf16>
    %1 = vector.shape_cast %0 : vector<1x8x2048xbf16> to vector<8x2048xbf16>
    %c0_2 = arith.constant 0 : index
    %c0_3 = arith.constant 0 : index
    %c0_4 = arith.constant 0 : index
    %2 = vector.load %arg2[%c0_2, %c0_3, %c0_4] : memref<1x2048x32xbf16, #tpu.memory_space<vmem>>, vector<1x2048x32xbf16>
    %3 = vector.shape_cast %2 : vector<1x2048x32xbf16> to vector<2048x32xbf16>
    %cst = arith.constant dense<0.000000e+00> : vector<8x32xf32>
    %4 = tpu.matmul %1, %3, %cst {dimension_numbers = #tpu.dot_dimension_numbers<[1], [0], [0], [1], [0, 0, 1, 1], [], []>} : vector<8x2048xbf16>, vector<2048x32xbf16>, vector<8x32xf32> -> vector<8x32xf32>
    %c0_5 = arith.constant 0 : index
    %c0_6 = arith.constant 0 : index
    %c0_7 = arith.constant 0 : index
    %5 = vector.load %arg3[%c0_5, %c0_6, %c0_7] : memref<1x1x32xf32, #tpu.memory_space<vmem>>, vector<1x1x32xf32>
    %6 = vector.shape_cast %5 : vector<1x1x32xf32> to vector<1x32xf32>
    %7 = vector.broadcast %6 : vector<1x32xf32> to vector<8x32xf32>
    %8 = arith.addf %4, %7 : vector<8x32xf32>
    %9 = vector.extract_strided_slice %8 {offsets = [0, 0], sizes = [8, 16], strides = [1, 1]} : vector<8x32xf32> to vector<8x16xf32>
    %10 = vector.extract_strided_slice %8 {offsets = [0, 16], sizes = [8, 16], strides = [1, 1]} : vector<8x32xf32> to vector<8x16xf32>
    %cst_8 = arith.constant 5.000000e-01 : f32
    %11 = vector.broadcast %cst_8 : f32 to vector<8x16xf32>
    %12 = arith.mulf %11, %10 : vector<8x16xf32>
    %13 = math.exp %12 : vector<8x16xf32>
    %14 = arith.mulf %13, %13 : vector<8x16xf32>
    %c0_9 = arith.constant 0 : index
    %c0_10 = arith.constant 0 : index
    %c0_11 = arith.constant 0 : index
    %15 = vector.load %arg4[%c0_9, %c0_10, %c0_11] : memref<1x8x16xf32, #tpu.memory_space<vmem>>, vector<1x8x16xf32>
    %16 = vector.shape_cast %15 : vector<1x8x16xf32> to vector<8x16xf32>
    %17 = arith.mulf %13, %16 : vector<8x16xf32>
    %18 = arith.addf %9, %17 : vector<8x16xf32>
    %19 = arith.truncf %18 : vector<8x16xf32> to vector<8x16xbf16>
    %c0_12 = arith.constant 0 : index
    %c0_13 = arith.constant 0 : index
    %c0_14 = arith.constant 0 : index
    %20 = vector.load %arg5[%c0_12, %c0_13, %c0_14] : memref<1x16x2048xbf16, #tpu.memory_space<vmem>>, vector<1x16x2048xbf16>
    %21 = vector.shape_cast %20 : vector<1x16x2048xbf16> to vector<16x2048xbf16>
    %cst_15 = arith.constant dense<0.000000e+00> : vector<8x2048xf32>
    %22 = tpu.matmul %19, %21, %cst_15 {dimension_numbers = #tpu.dot_dimension_numbers<[1], [0], [0], [1], [0, 0, 1, 1], [], []>} : vector<8x16xbf16>, vector<16x2048xbf16>, vector<8x2048xf32> -> vector<8x2048xf32>
    %c0_16 = arith.constant 0 : index
    %c0_17 = arith.constant 0 : index
    %c0_18 = arith.constant 0 : index
    %23 = vector.load %arg6[%c0_16, %c0_17, %c0_18] : memref<1x1x2048xf32, #tpu.memory_space<vmem>>, vector<1x1x2048xf32>
    %24 = vector.shape_cast %23 : vector<1x1x2048xf32> to vector<1x2048xf32>
    %25 = vector.broadcast %24 : vector<1x2048xf32> to vector<8x2048xf32>
    %26 = arith.addf %22, %25 : vector<8x2048xf32>
    %cst_19 = arith.constant 0.000000e+00 : f32
    %27 = vector.broadcast %cst_19 : f32 to vector<8x2048xf32>
    %28 = arith.maximumf %26, %27 : vector<8x2048xf32>
    %c0_20 = arith.constant 0 : index
    %c0_21 = arith.constant 0 : index
    %c0_22 = arith.constant 0 : index
    %29 = vector.load %arg7[%c0_20, %c0_21, %c0_22] : memref<1x8x2048xf32, #tpu.memory_space<vmem>>, vector<1x8x2048xf32>
    %30 = vector.shape_cast %29 : vector<1x8x2048xf32> to vector<8x2048xf32>
    %31 = vector.shape_cast %28 : vector<8x2048xf32> to vector<1x8x2048xf32>
    tpu.vector_store %arg7[%c0_20, %c0_21, %c0_22], %31 {strides = array<i32>} : memref<1x8x2048xf32, #tpu.memory_space<vmem>>, vector<1x8x2048xf32>,
    %32 = tpu.concatenate %18, %9, %14, %10 in 1 : vector<8x16xf32>, vector<8x16xf32>, vector<8x16xf32>, vector<8x16xf32> -> vector<8x64xf32>
    %c0_23 = arith.constant 0 : index
    %c0_24 = arith.constant 0 : index
    %c0_25 = arith.constant 0 : index
    %33 = vector.load %arg8[%c0_23, %c0_24, %c0_25] : memref<1x8x64xf32, #tpu.memory_space<vmem>>, vector<1x8x64xf32>
    %34 = vector.shape_cast %33 : vector<1x8x64xf32> to vector<8x64xf32>
    %35 = vector.shape_cast %32 : vector<8x64xf32> to vector<1x8x64xf32>
    tpu.vector_store %arg8[%c0_23, %c0_24, %c0_25], %35 {strides = array<i32>} : memref<1x8x64xf32, #tpu.memory_space<vmem>>, vector<1x8x64xf32>,
    return
  }
  func.func @transform_0(%arg0: i32) -> (i32, i32, i32) {
    %c0_i32 = arith.constant 0 : i32
    %c0_i32_0 = arith.constant 0 : i32
    %c0_i32_1 = arith.constant 0 : i32
    return %arg0, %c0_i32, %c0_i32_0 : i32, i32, i32
  }
  func.func @transform_1(%arg0: i32) -> (i32, i32, i32) {
    %c0_i32 = arith.constant 0 : i32
    %c0_i32_0 = arith.constant 0 : i32
    %c0_i32_1 = arith.constant 0 : i32
    return %arg0, %c0_i32, %c0_i32_0 : i32, i32, i32
  }
  func.func @transform_2(%arg0: i32) -> (i32, i32, i32) {
    %c0_i32 = arith.constant 0 : i32
    %c0_i32_0 = arith.constant 0 : i32
    %c0_i32_1 = arith.constant 0 : i32
    return %arg0, %c0_i32, %c0_i32_0 : i32, i32, i32
  }
  func.func @transform_3(%arg0: i32) -> (i32, i32, i32) {
    %c0_i32 = arith.constant 0 : i32
    %c0_i32_0 = arith.constant 0 : i32
    %c0_i32_1 = arith.constant 0 : i32
    return %arg0, %c0_i32, %c0_i32_0 : i32, i32, i32
  }
  func.func @transform_4(%arg0: i32) -> (i32, i32, i32) {
    %c0_i32 = arith.constant 0 : i32
    %c0_i32_0 = arith.constant 0 : i32
    %c0_i32_1 = arith.constant 0 : i32
    return %arg0, %c0_i32, %c0_i32_0 : i32, i32, i32
  }
  func.func @transform_5(%arg0: i32) -> (i32, i32, i32) {
    %c0_i32 = arith.constant 0 : i32
    %c0_i32_0 = arith.constant 0 : i32
    %c0_i32_1 = arith.constant 0 : i32
    return %arg0, %c0_i32, %c0_i32_0 : i32, i32, i32
  }
  func.func @transform_6(%arg0: i32) -> (i32, i32, i32) {
    %c0_i32 = arith.constant 0 : i32
    %c0_i32_0 = arith.constant 0 : i32
    %c0_i32_1 = arith.constant 0 : i32
    return %arg0, %c0_i32, %c0_i32_0 : i32, i32, i32
  }
  func.func @transform_7(%arg0: i32) -> (i32, i32, i32) {
    %c0_i32 = arith.constant 0 : i32
    %c0_i32_0 = arith.constant 0 : i32
    %c0_i32_1 = arith.constant 0 : i32
    return %arg0, %c0_i32, %c0_i32_0 : i32, i32, i32
  }
}

module attributes {stable_mosaic.version = 11 : i64} {
  func.func @_conv_kernel(%arg0: i32, %arg1: i32, %arg2: memref<1x8x80xbf16, #tpu.memory_space<vmem>>, %arg3: memref<1x80x256xbf16, #tpu.memory_space<vmem>>, %arg4: memref<1x8x1xf32, #tpu.memory_space<vmem>>, %arg5: memref<1x1x8x256xf32, #tpu.memory_space<vmem>>) attributes {dimension_semantics = [#tpu.dimension_semantics<parallel>, #tpu.dimension_semantics<parallel>], iteration_bounds = array<i64: 2, 2>, scalar_prefetch = 0 : i64, scratch_operands = 0 : i64, tpu.core_type = #tpu.core_type<tc>, window_params = [{transform_indices = @transform_0, window_bounds = array<i64: 1, 8, 80>}, {transform_indices = @transform_1, window_bounds = array<i64: 1, 80, 256>}, {transform_indices = @transform_2, window_bounds = array<i64: 1, 8, 1>}, {transform_indices = @transform_3, window_bounds = array<i64: 1, 1, 8, 256>}]} {
    %c0 = arith.constant 0 : index
    %c0_0 = arith.constant 0 : index
    %c0_1 = arith.constant 0 : index
    %0 = vector.load %arg2[%c0, %c0_0, %c0_1] : memref<1x8x80xbf16, #tpu.memory_space<vmem>>, vector<1x8x80xbf16>
    %1 = vector.shape_cast %0 : vector<1x8x80xbf16> to vector<8x80xbf16>
    %c0_2 = arith.constant 0 : index
    %c0_3 = arith.constant 0 : index
    %c0_4 = arith.constant 0 : index
    %2 = vector.load %arg3[%c0_2, %c0_3, %c0_4] : memref<1x80x256xbf16, #tpu.memory_space<vmem>>, vector<1x80x256xbf16>
    %3 = vector.shape_cast %2 : vector<1x80x256xbf16> to vector<80x256xbf16>
    %cst = arith.constant dense<0.000000e+00> : vector<8x256xf32>
    %4 = tpu.matmul %1, %3, %cst {dimension_numbers = #tpu.dot_dimension_numbers<[1], [0], [0], [1], [0, 0, 1, 1], [], []>} : vector<8x80xbf16>, vector<80x256xbf16>, vector<8x256xf32> -> vector<8x256xf32>
    %c0_5 = arith.constant 0 : index
    %c0_6 = arith.constant 0 : index
    %c0_7 = arith.constant 0 : index
    %5 = vector.load %arg4[%c0_5, %c0_6, %c0_7] : memref<1x8x1xf32, #tpu.memory_space<vmem>>, vector<1x8x1xf32>
    %6 = vector.shape_cast %5 : vector<1x8x1xf32> to vector<8x1xf32>
    %7 = vector.broadcast %6 : vector<8x1xf32> to vector<8x256xf32>
    %8 = arith.addf %4, %7 : vector<8x256xf32>
    %c0_8 = arith.constant 0 : index
    %c0_9 = arith.constant 0 : index
    %c0_10 = arith.constant 0 : index
    %c0_11 = arith.constant 0 : index
    %9 = vector.load %arg5[%c0_8, %c0_9, %c0_10, %c0_11] : memref<1x1x8x256xf32, #tpu.memory_space<vmem>>, vector<1x1x8x256xf32>
    %10 = vector.shape_cast %9 : vector<1x1x8x256xf32> to vector<8x256xf32>
    %11 = vector.shape_cast %8 : vector<8x256xf32> to vector<1x1x8x256xf32>
    tpu.vector_store %arg5[%c0_8, %c0_9, %c0_10, %c0_11], %11 {strides = array<i32>} : memref<1x1x8x256xf32, #tpu.memory_space<vmem>>, vector<1x1x8x256xf32>,
    return
  }
  func.func @transform_0(%arg0: i32, %arg1: i32) -> (i32, i32, i32) {
    %c0_i32 = arith.constant 0 : i32
    %c0_i32_0 = arith.constant 0 : i32
    %c0_i32_1 = arith.constant 0 : i32
    return %arg0, %c0_i32, %c0_i32_0 : i32, i32, i32
  }
  func.func @transform_1(%arg0: i32, %arg1: i32) -> (i32, i32, i32) {
    %c0_i32 = arith.constant 0 : i32
    %c0_i32_0 = arith.constant 0 : i32
    return %arg0, %c0_i32, %arg1 : i32, i32, i32
  }
  func.func @transform_2(%arg0: i32, %arg1: i32) -> (i32, i32, i32) {
    %c0_i32 = arith.constant 0 : i32
    %c0_i32_0 = arith.constant 0 : i32
    %c0_i32_1 = arith.constant 0 : i32
    return %arg0, %c0_i32, %c0_i32_0 : i32, i32, i32
  }
  func.func @transform_3(%arg0: i32, %arg1: i32) -> (i32, i32, i32, i32) {
    %c0_i32 = arith.constant 0 : i32
    %c0_i32_0 = arith.constant 0 : i32
    %c0_i32_1 = arith.constant 0 : i32
    return %arg0, %arg1, %c0_i32, %c0_i32_0 : i32, i32, i32, i32
  }
}

</mosaic_0001>

<bundles_post_ra>
// kernel: cor_vae_conv_forward.3
= control target key start
LH: loop header
LB: loop body
LE: loop exit
PB: predicated region body
PF: predicated region fallthrough
CT: control target
= control target key end

     0   :  { %s699_s12 = smov 0   ;;  %s701_s13 = smov 0   ;;  %s802_s0 = inlined_call_operand.vmem [shape: bf16[2,8,64], index: 0, kind: input, shape index: {}]   ;;  %s803_s1 = inlined_call_operand.vmem [shape: bf16[2,64,512], index: 1, kind: input, shape index: {}]   ;;  %s804_s2 = inlined_call_operand.vmem [shape: f32[2,8,1], index: 2, kind: input, shape index: {}]   ;;  %s805_s3 = inlined_call_operand.vmem [shape: f32[2,2,8,256], index: 3, kind: output, shape index: {}]  }
   0x1   :  { %s703_s14 = smov 0   ;;  %s705_s15 = smov 0  }
   0x2   :  { %s707_s16 = smov 0   ;;  %s709_s17 = smov 0  }
   0x3   :  { %s711_s18 = smov 0  }
   0x4 LB: > { %s22_s19 = sadd.s32 1, %s668_s16  ;;  %s25_s20 = sadd.s32 1, %s672_s17  ;;  %s676_s18 = sphi %s711_s18, %s13_s18   ;;  %s672_s17 = sphi %s709_s17, %s811_s17   ;;  %s668_s16 = sphi %s707_s16, %s810_s16   ;;  %s664_s15 = sphi %s705_s15, %s809_s15   ;;  %s660_s14 = sphi %s703_s14, %s808_s14   ;;  %s656_s13 = sphi %s701_s13, %s807_s13   ;;  %s652_s12 = sphi %s699_s12, %s806_s12  }
   0x5   : > { %p23_p0 = scmp.ge.s32.totalorder %s22_s19, 2  ;;  %p67_p1 = scmp.ne.s32.totalorder %s656_s13, %s652_s12 }
   0x6   : > { %p68_p2 = scmp.eq.s32.totalorder %s676_s18, 0  ;;  %s60_s24 = sadd.s32 1, %s656_s13 }
   0x7   : > { %s813_s19 = smov (%p23_p0, %s22_s19), 0  ;;  %s815_s20 = smov (!%p23_p0, %s25_s20), %s672_s17 }
   0x8   : > { %p69_p3 = por %p68_p2, %p67_p1  ;;  %p27_p4 = scmp.ge.s32.totalorder %s815_s20, 2 }
   0x9   : > { %s56_s21 = ssub.s32 %s668_s16, %s813_s19  ;;  %p508_p6 = scmp.ge.s32.totalorder %s676_s18, 4 }
   0xa   : > { %s817_s20 = smov (%p27_p4, %s815_s20), 0 }
   0xb   : > { %s55_s22 = ssub.s32 %s672_s17, %s817_s20  ;;  %147 = sbr.rel (%p508_p6) target bundleno = 31 (0x1f), region = 16 }
   0xc   : > { %s57_s23 = sor.u32 %s56_s21, %s55_s22 }
   0xd   : > { %p58_p5 = scmp.eq.s32.totalorder %s57_s23, 0 }
   0xf   : > { %s750_s25 = scalar_select %p58_p5, %s656_s13, %s60_s24  }
  0x10   : > { %157 = sbr.rel (!%p69_p3) target bundleno = 31 (0x1f), region = 24  ;;  %s159_s26 = sand.u32 (%p69_p3), 1, %s656_s13  }
  0x11   : > { %s510_s27 = sshll.u32 (%p69_p3), %s668_s16, 1  ;;  %s509_s28 = sshll.u32 (%p69_p3), %s159_s26, 6 }
  0x12   : > { %s511_s29 = sshll.u32 (%p69_p3), %s672_s17, 5  ;;  %s161_s8 = scalar_lea.vmem (%p69_p3), [#allocation2], %s509_s28 }
  0x13   : > { %s164_s30 = sadd.s32 (%p69_p3), %s511_s29, %s510_s27 }
  0x14   : > { %s512_s4 = sshll.u32 (%p69_p3), %s164_s30, 2 }
  0x15   : > { %s166_s7 = scalar_lea.vmem %s803_s1, %s512_s4 }
  0x16   : > { %v209_v0 = vld [vmem:[%s166_s7] sm:$0xff]  ;;  %v211_v1 = vld [vmem:[%s166_s7 + $0x10] sm:$0xff] }
  0x17   : > { %v213_v2 = vld [vmem:[%s166_s7 + $0x20] sm:$0xff]  ;;  %210 = vst [vmem:[%s161_s8] sm:$0xff] %v209_v0  ;;  %v215_v3 = vld [vmem:[%s166_s7 + $0x30] sm:$0xff] }
  0x18   : > { %212 = vst [vmem:[%s161_s8 + $0x8] sm:$0xff] %v211_v1  ;;  %v217_v4 = vld [vmem:[%s166_s7 + $0x40] sm:$0xff]  ;;  %v219_v5 = vld [vmem:[%s166_s7 + $0x50] sm:$0xff] }
  0x19   : > { %214 = vst [vmem:[%s161_s8 + $0x10] sm:$0xff] %v213_v2  ;;  %v221_v6 = vld [vmem:[%s166_s7 + $0x60] sm:$0xff]  ;;  %v223_v7 = vld [vmem:[%s166_s7 + $0x70] sm:$0xff] }
  0x1a   : > { %216 = vst [vmem:[%s161_s8 + $0x18] sm:$0xff] %v215_v3 }
  0x1b   : > { %218 = vst [vmem:[%s161_s8 + $0x20] sm:$0xff] %v217_v4 }
  0x1c   : > { %220 = vst [vmem:[%s161_s8 + $0x28] sm:$0xff] %v219_v5 }
  0x1d   : > { %222 = vst [vmem:[%s161_s8 + $0x30] sm:$0xff] %v221_v6 }
  0x1e   : > { %224 = vst [vmem:[%s161_s8 + $0x38] sm:$0xff] %v223_v7 }
  0x1f PF: > { %p513_p7 = scmp.ge.s32.totalorder %s676_s18, 1  ;;  %p236_p8 = scmp.lt.s32.totalorder %s676_s18, 5 }
  0x21   : > { %p237_p9 = pnand %p513_p7, %p236_p8 }
  0x22   : > { %s243_s9 = sand.u32 (!%p237_p9), 1, %s652_s12   ;;  %p278_p10 = scmp.lt.s32.totalorder (!%p237_p9), %s664_s15, 1 }
  0x23   : > { %240 = sbr.rel (%p237_p9) target bundleno = 193 (0xc1), region = 66  ;;  %s514_s10 = sshll.u32 (!%p237_p9), %s243_s9, 6 }
  0x24   : > { %s245_s11 = scalar_lea.vmem (!%p237_p9), [#allocation2], %s514_s10  ;;  %p289_p11 = scmp.lt.s32.totalorder (!%p237_p9), %s660_s14, 1 }
  0x28   : > { %v678_v8 = vmov 0   ;;  %v546_v9 = vld [vmem:[%s245_s11 + $0x30] sm:$0xf]  ;;  %v563_v10 = vld [vmem:[%s245_s11 + $0x34] sm:$0xf0]  ;;  %s819_s15 = smov (!%p278_p10, %s664_s15), 1 }
  0x29   : > { %621 = vset.pattern.permute.xlu0 %v678_v8  ;;  %v562_v11 = vld [vmem:[%s245_s11 + $0x34] sm:$0xf]  ;;  %v547_v12 = vor.u32 %v563_v10, %v546_v9  ;;  %v548_v13 = vld [vmem:[%s245_s11 + $0x38] sm:$0xf0]  ;;  %v538_v14 = vld [vmem:[%s245_s11 + $0x20] sm:$0xf] }
  0x2a   : > { %v561_v15 = vld [vmem:[%s245_s11 + $0x24] sm:$0xf0]  ;;  %v551_v16 = vor.u32 %v562_v11, %v548_v13  ;;  %v560_v17 = vld [vmem:[%s245_s11 + $0x24] sm:$0xf]  ;;  %v540_v18 = vld [vmem:[%s245_s11 + $0x28] sm:$0xf0] }
  0x2b   : > { %360 = vmatpush.bf16.msra.mxu0 %v547_v12  ;;  %v539_v19 = vor.u32 %v561_v15, %v538_v14  ;;  %v543_v20 = vor.u32 %v560_v17, %v540_v18  ;;  %v530_v21 = vld [vmem:[%s245_s11 + $0x10] sm:$0xf]  ;;  %v559_v22 = vld [vmem:[%s245_s11 + $0x14] sm:$0xf0]  ;;  %v558_v23 = vld [vmem:[%s245_s11 + $0x14] sm:$0xf] }
  0x2c   : > { %373 = vmatpush.bf16.msra.mxu1 %v551_v16  ;;  %v532_v24 = vld [vmem:[%s245_s11 + $0x18] sm:$0xf0]  ;;  %v531_v25 = vor.u32 %v559_v22, %v530_v21  ;;  %s516_s12 = sshll.u32 %s819_s15, 3  ;;  %v522_v27 = vld [vmem:[%s245_s11] sm:$0xf]  ;;  %s515_s21 = sshll.u32 %s819_s15, 2 }
  0x2d   : > { %v535_v26 = vor.u32 %v558_v23, %v532_v24  ;;  %v557_v28 = vld [vmem:[%s245_s11 + $0x4] sm:$0xf0]  ;;  %v556_v29 = vld [vmem:[%s245_s11 + $0x4] sm:$0xf]  ;;  %v524_v30 = vld [vmem:[%s245_s11 + $0x8] sm:$0xf0]  ;;  %s286_s24 = scalar_lea.vmem %s804_s2, %s516_s12  ;;  %s281_s28 = scalar_lea.vmem %s802_s0, %s515_s21 }
  0x2e   : > { %v306_v31 = vld [vmem:[%s286_s24] sm:$0xff]  ;;  %v523_v32 = vor.u32 %v557_v28, %v522_v27  ;;  %v527_v33 = vor.u32 %v556_v29, %v524_v30  ;;  %vm352_vm0 = vcmask 523264   ;;  %s821_s14 = smov (!%p289_p11, %s660_s14), 1 }
  0x2f   : > { %361 = vmatpush.bf16.msra.mxu0 %v539_v19  ;;  %309 = vperm.xlu0 %621, %v306_v31   ;;  %v297_v34 = vld [vmem:[%s281_s28] sm:$0xf]  ;;  %s517_s15 = sshll.u32 %s821_s14, 1 }
  0x30   : > { %374 = vmatpush.bf16.msra.mxu1 %v543_v20  ;;  %s293_s29 = sadd.s32 %s517_s15, %s515_s21 }
  0x31   : > { %s519_s30 = sshll.u32 %s293_s29, 3 }
  0x32   : > { %s295_s6 = scalar_lea.vmem %s805_s3, %s519_s30 }
  0x33   : > { %362 = vmatpush.bf16.msra.mxu0 %v531_v25 }
  0x34   : > { %375 = vmatpush.bf16.msra.mxu1 %v535_v26 }
  0x37   : > { %363 = vmatpush.bf16.msra.mxu0 %v523_v32 }
  0x38   : > { %376 = vmatpush.bf16.msra.mxu1 %v527_v33 }
  0x3a   : > { %552 = vmatmul.msk.bf16.vlgmr.msra.gmra.mxu0 %vm352_vm0, %v297_v34 }
  0x3b   : > { %553 = vmatmul.msk.bf16.vlgmr.msra.gmra.mxu1 %vm352_vm0, %v297_v34 }
  0xa1   : > { %v310_v35 = vpop.permute.xlu0 %309 }
  0xb7   : > { %v365_v36 = vpop.f32.mrf.mxu0 }
  0xb8   : > { %v366_v37 = vadd.f32 %v365_v36, %v310_v35  ;;  %v378_v38 = vpop.f32.mrf.mxu1 }
  0xb9   : > { %v379_v39 = vadd.f32 %v378_v38, %v310_v35 }
  0xba   : > { %v382_v40 = vmax.f32 %v366_v37, 0.0 }
  0xbb   : > { %v383_v41 = vmax.f32 %v379_v39, 0.0 }
  0xbc   : > { %384 = vst [vmem:[%s295_s6] sm:$0xff] %v382_v40 }
  0xbd   : > { %385 = vst [vmem:[%s295_s6 + $0x8] sm:$0xff] %v383_v41 }
  0xbf   : > { %v367_v42 = vpop.f32.mrf.mxu0 }
  0xc0   : > { %v380_v43 = vpop.f32.mrf.mxu1 }
  0xc1 PF: > { %s13_s18 = sadd.s32 1, %s676_s18   ;;  %s806_s12 = smov %s656_s13 }
  0xc2   : > { %p10_p12 = scmp.ge.s32.totalorder %s13_s18, 6   ;;  %s807_s13 = smov %s750_s25 }
  0xc3   : > { %s808_s14 = smov %s668_s16  ;;  %s809_s15 = smov %s672_s17 }
  0xc4   : > { %s810_s16 = smov %s813_s19  ;;  %s811_s17 = smov %s817_s20 }
  0xc5   :  { %12 = sbr.rel (!%p10_p12) target bundleno = 4 (0x4), region = 111 }

// kernel: cor_vae_conv_forward.4
= control target key start
LH: loop header
LB: loop body
LE: loop exit
PB: predicated region body
PF: predicated region fallthrough
CT: control target
= control target key end

     0   :  { %s3055_s24 = smov 0   ;;  %s3328_s0 = inlined_call_operand.vmem [shape: bf16[2,8,2048], index: 0, kind: input, shape index: {}]   ;;  %s3329_s1 = inlined_call_operand.vmem [shape: bf16[2,2048,32], index: 1, kind: input, shape index: {}]   ;;  %s3330_s2 = inlined_call_operand.vmem [shape: f32[2,1,32], index: 2, kind: input, shape index: {}]   ;;  %s3331_s3 = inlined_call_operand.vmem [shape: f32[2,8,16], index: 3, kind: input, shape index: {}]   ;;  %s3332_s4 = inlined_call_operand.vmem [shape: bf16[2,16,2048], index: 4, kind: input, shape index: {}]   ;;  %s3333_s5 = inlined_call_operand.vmem [shape: f32[2,1,2048], index: 5, kind: input, shape index: {}]   ;;  %s3334_s6 = inlined_call_operand.vmem [shape: f32[2,8,2048], index: 6, kind: output, shape index: {0}]   ;;  %s3335_s7 = inlined_call_operand.vmem [shape: f32[2,8,64], index: 7, kind: output, shape index: {1}]  }
   0x1 LB: > { %s2232_s25 = sadd.s32 4294967295, %s3010_s24   ;;  %p2236_p0 = scmp.ge.s32.totalorder %s3010_s24, 1  ;;  %s3010_s24 = sphi %s3055_s24, %s18_s24  }
   0x2   : > { %p286_p1 = scmp.lt.s32.totalorder %s3010_s24, 3 }
   0x4   : > { %p287_p2 = pnand %p2236_p0, %p286_p1 }
   0x5   : > { %p343_p3 = scmp.lt.s32.totalorder (!%p287_p2), %s2232_s25, 1  ;;  %s3012_s18 = smov (!%p287_p2), 16  }
   0x6   : > { %290 = sbr.rel (%p287_p2) target bundleno = 601 (0x259), region = 44  ;;  %s3013_s21 = smov (!%p287_p2), 32  }
   0x7   : > { %s3014_s22 = smov (!%p287_p2), 112  }
   0xb   : > { %s3337_s25 = smov (!%p343_p3, %s2232_s25), 1  ;;  %vm1827_vm0 = vcmask 130048   ;;  %vm2083_vm1 = vcmask 261120   ;;  %vm2085_vm2 = vcmask 392192   ;;  %vm2087_vm3 = vcmask 523264  }
   0xc   : > { %s2843_s26 = sshll.u32 %s3337_s25, 10  ;;  %s2842_s30 = sshll.u32 %s3337_s25, 6 }
   0xd   : > { %s3069_s29 = scalar_lea.vmem %s3329_s1, %s2843_s26  ;;  %s355_s10 = scalar_lea.vmem %s3330_s2, %s3337_s25 }
   0xe   : > { %v2853_v0 = vld [vmem:[%s3069_s29 + $0x38] sm:$0xff]  ;;  %v2852_v4 = vld [vmem:[%s3069_s29 + $0x30] sm:$0xff]  ;;  %v2851_v8 = vld [vmem:[%s3069_s29 + $0x28] sm:$0xff]  ;;  %s3103_s13 = scalar_lea.vmem %s3328_s0, %s2842_s30  ;;  %s2241_s14 = sshll.u32 %s3337_s25, 3 }
   0xf   : > { %v2861_v1 = vld [vmem:[%s3069_s29 + $0x78] sm:$0xff]  ;;  %1471 = vmatpush.bf16.msra.mxu0 %v2853_v0  ;;  %v2860_v5 = vld [vmem:[%s3069_s29 + $0x70] sm:$0xff]  ;;  %v2859_v9 = vld [vmem:[%s3069_s29 + $0x68] sm:$0xff]  ;;  %s359_s17 = scalar_lea.vmem %s3331_s3, %s2241_s14  ;;  %s2844_s23 = sshll.u32 %s3337_s25, 7 }
  0x10   : > { %v2869_v2 = vld [vmem:[%s3069_s29 + $0xb8] sm:$0xff]  ;;  %1484 = vmatpush.bf16.msra.mxu1 %v2861_v1  ;;  %v2868_v6 = vld [vmem:[%s3069_s29 + $0xb0] sm:$0xff]  ;;  %v2867_v10 = vld [vmem:[%s3069_s29 + $0xa8] sm:$0xff]  ;;  %s3237_s28 = scalar_lea.vmem %s3332_s4, %s2844_s23  ;;  %s377_s8 = scalar_lea.vmem %s3335_s7, %s2241_s14 }
  0x11   : > { %v2877_v3 = vld [vmem:[%s3069_s29 + $0xf8] sm:$0xff]  ;;  %1497 = vmatpush.bf16.msra.mxu2 %v2869_v2  ;;  %v2876_v7 = vld [vmem:[%s3069_s29 + $0xf0] sm:$0xff]  ;;  %v2875_v11 = vld [vmem:[%s3069_s29 + $0xe8] sm:$0xff]  ;;  %s2244_s9 = sshll.u32 %s3337_s25, 4  ;;  %s3306_s15 = scalar_lea.vmem %s3334_s6, %s2844_s23 }
  0x12   : > { %1510 = vmatpush.bf16.msra.mxu3 %v2877_v3  ;;  %v2850_v12 = vld [vmem:[%s3069_s29 + $0x20] sm:$0xff]  ;;  %v2849_v16 = vld [vmem:[%s3069_s29 + $0x18] sm:$0xff]  ;;  %v2848_v20 = vld [vmem:[%s3069_s29 + $0x10] sm:$0xff]  ;;  %s3298_s12 = scalar_lea.vmem %s3333_s5, %s2244_s9 }
  0x13   : > { %1472 = vmatpush.bf16.msra.mxu0 %v2852_v4  ;;  %v2858_v13 = vld [vmem:[%s3069_s29 + $0x60] sm:$0xff]  ;;  %v2857_v17 = vld [vmem:[%s3069_s29 + $0x58] sm:$0xff]  ;;  %v2856_v21 = vld [vmem:[%s3069_s29 + $0x50] sm:$0xff] }
  0x14   : > { %1485 = vmatpush.bf16.msra.mxu1 %v2860_v5  ;;  %v2866_v14 = vld [vmem:[%s3069_s29 + $0xa0] sm:$0xff]  ;;  %v2865_v18 = vld [vmem:[%s3069_s29 + $0x98] sm:$0xff]  ;;  %v2864_v22 = vld [vmem:[%s3069_s29 + $0x90] sm:$0xff] }
  0x15   : > { %1498 = vmatpush.bf16.msra.mxu2 %v2868_v6  ;;  %v2874_v15 = vld [vmem:[%s3069_s29 + $0xe0] sm:$0xff]  ;;  %v2873_v19 = vld [vmem:[%s3069_s29 + $0xd8] sm:$0xff]  ;;  %v2872_v23 = vld [vmem:[%s3069_s29 + $0xd0] sm:$0xff] }
  0x16   : > { %1511 = vmatpush.bf16.msra.mxu3 %v2876_v7  ;;  %v2847_v24 = vld [vmem:[%s3069_s29 + $0x8] sm:$0xff]  ;;  %v379_v29 = vld [vmem:[%s3103_s13] sm:$0xff]  ;;  %v2885_v38 = vld [vmem:[%s3069_s29 + $0x138] sm:$0xff] }
  0x17   : > { %1473 = vmatpush.bf16.msra.mxu0 %v2851_v8  ;;  %v2855_v25 = vld [vmem:[%s3069_s29 + $0x48] sm:$0xff]  ;;  %v2846_v30 = vld [vmem:[%s3069_s29] sm:$0xff]  ;;  %v655_v33 = vunpack.c.l.b16 %v379_v29  ;;  %v656_v37 = vunpack.c.h.b16 %v379_v29  ;;  %v2893_v39 = vld [vmem:[%s3069_s29 + $0x178] sm:$0xff] }
  0x18   : > { %1486 = vmatpush.bf16.msra.mxu1 %v2859_v9  ;;  %v2863_v26 = vld [vmem:[%s3069_s29 + $0x88] sm:$0xff]  ;;  %v2854_v31 = vld [vmem:[%s3069_s29 + $0x40] sm:$0xff]  ;;  %v2901_v40 = vld [vmem:[%s3069_s29 + $0x1b8] sm:$0xff] }
  0x19   : > { %1499 = vmatpush.bf16.msra.mxu2 %v2867_v10  ;;  %v2871_v27 = vld [vmem:[%s3069_s29 + $0xc8] sm:$0xff]  ;;  %v2862_v34 = vld [vmem:[%s3069_s29 + $0x80] sm:$0xff]  ;;  %v2909_v41 = vld [vmem:[%s3069_s29 + $0x1f8] sm:$0xff]  ;;  %v671_v43 = vpack.c.b16 %v655_v33, %v655_v33  ;;  %v672_v45 = vpack.c.b16 %v656_v37, %v656_v37 }
  0x1a   : > { %1512 = vmatpush.bf16.msra.mxu3 %v2875_v11  ;;  %v380_v28 = vld [vmem:[%s3103_s13 + $0x8] sm:$0xff]  ;;  %v2870_v35 = vld [vmem:[%s3069_s29 + $0xc0] sm:$0xff]  ;;  %v2884_v46 = vld [vmem:[%s3069_s29 + $0x130] sm:$0xff] }
  0x1b   : > { %1474 = vmatpush.bf16.msra.mxu0 %v2850_v12  ;;  %v657_v32 = vunpack.c.l.b16 %v380_v28  ;;  %v658_v36 = vunpack.c.h.b16 %v380_v28  ;;  %v2892_v47 = vld [vmem:[%s3069_s29 + $0x170] sm:$0xff]  ;;  %v2883_v50 = vld [vmem:[%s3069_s29 + $0x128] sm:$0xff]  ;;  %v2882_v54 = vld [vmem:[%s3069_s29 + $0x120] sm:$0xff] }
  0x1c   : > { %1487 = vmatpush.bf16.msra.mxu1 %v2858_v13  ;;  %v2900_v48 = vld [vmem:[%s3069_s29 + $0x1b0] sm:$0xff]  ;;  %v2891_v51 = vld [vmem:[%s3069_s29 + $0x168] sm:$0xff]  ;;  %v2890_v55 = vld [vmem:[%s3069_s29 + $0x160] sm:$0xff] }
  0x1d   : > { %1500 = vmatpush.bf16.msra.mxu2 %v2866_v14  ;;  %v673_v42 = vpack.c.b16 %v657_v32, %v657_v32  ;;  %v674_v44 = vpack.c.b16 %v658_v36, %v658_v36  ;;  %v2908_v49 = vld [vmem:[%s3069_s29 + $0x1f0] sm:$0xff]  ;;  %v2899_v52 = vld [vmem:[%s3069_s29 + $0x1a8] sm:$0xff]  ;;  %v2898_v56 = vld [vmem:[%s3069_s29 + $0x1a0] sm:$0xff] }
  0x1e   : > { %1513 = vmatpush.bf16.msra.mxu3 %v2874_v15  ;;  %v2907_v53 = vld [vmem:[%s3069_s29 + $0x1e8] sm:$0xff]  ;;  %v2906_v57 = vld [vmem:[%s3069_s29 + $0x1e0] sm:$0xff]  ;;  %v2881_v58 = vld [vmem:[%s3069_s29 + $0x118] sm:$0xff] }
  0x1f   : > { %1475 = vmatpush.bf16.msra.mxu0 %v2849_v16  ;;  %v2889_v59 = vld [vmem:[%s3069_s29 + $0x158] sm:$0xff]  ;;  %v2880_v62 = vld [vmem:[%s3069_s29 + $0x110] sm:$0xff]  ;;  %v2879_v2 = vld [vmem:[%s3069_s29 + $0x108] sm:$0xff] }
  0x20   : > { %1488 = vmatpush.bf16.msra.mxu1 %v2857_v17  ;;  %v2897_v60 = vld [vmem:[%s3069_s29 + $0x198] sm:$0xff]  ;;  %v2888_v63 = vld [vmem:[%s3069_s29 + $0x150] sm:$0xff]  ;;  %v2887_v3 = vld [vmem:[%s3069_s29 + $0x148] sm:$0xff] }
  0x21   : > { %1501 = vmatpush.bf16.msra.mxu2 %v2865_v18  ;;  %v2905_v61 = vld [vmem:[%s3069_s29 + $0x1d8] sm:$0xff]  ;;  %v2896_v0 = vld [vmem:[%s3069_s29 + $0x190] sm:$0xff]  ;;  %v2895_v4 = vld [vmem:[%s3069_s29 + $0x188] sm:$0xff] }
  0x22   : > { %1514 = vmatpush.bf16.msra.mxu3 %v2873_v19  ;;  %v2904_v1 = vld [vmem:[%s3069_s29 + $0x1d0] sm:$0xff]  ;;  %v2903_v5 = vld [vmem:[%s3069_s29 + $0x1c8] sm:$0xff]  ;;  %v382_v6 = vld [vmem:[%s3103_s13 + $0x18] sm:$0xff] }
  0x23   : > { %1476 = vmatpush.bf16.msra.mxu0 %v2848_v20  ;;  %v381_v7 = vld [vmem:[%s3103_s13 + $0x10] sm:$0xff]  ;;  %v2878_v8 = vld [vmem:[%s3069_s29 + $0x100] sm:$0xff]  ;;  %v661_v10 = vunpack.c.l.b16 %v382_v6  ;;  %v662_v14 = vunpack.c.h.b16 %v382_v6  ;;  %v2917_v16 = vld [vmem:[%s3069_s29 + $0x238] sm:$0xff] }
  0x24   : > { %1489 = vmatpush.bf16.msra.mxu1 %v2856_v21  ;;  %v2886_v9 = vld [vmem:[%s3069_s29 + $0x140] sm:$0xff]  ;;  %v659_v11 = vunpack.c.l.b16 %v381_v7  ;;  %v660_v15 = vunpack.c.h.b16 %v381_v7  ;;  %v2925_v17 = vld [vmem:[%s3069_s29 + $0x278] sm:$0xff]  ;;  %v2915_v28 = vld [vmem:[%s3069_s29 + $0x228] sm:$0xff] }
  0x25   : > { %1502 = vmatpush.bf16.msra.mxu2 %v2864_v22  ;;  %v2894_v12 = vld [vmem:[%s3069_s29 + $0x180] sm:$0xff]  ;;  %v2933_v18 = vld [vmem:[%s3069_s29 + $0x2b8] sm:$0xff]  ;;  %v677_v20 = vpack.c.b16 %v661_v10, %v661_v10  ;;  %v678_v22 = vpack.c.b16 %v662_v14, %v662_v14  ;;  %v2923_v29 = vld [vmem:[%s3069_s29 + $0x268] sm:$0xff] }
  0x26   : > { %1515 = vmatpush.bf16.msra.mxu3 %v2872_v23  ;;  %v2902_v13 = vld [vmem:[%s3069_s29 + $0x1c0] sm:$0xff]  ;;  %v2941_v19 = vld [vmem:[%s3069_s29 + $0x2f8] sm:$0xff]  ;;  %v675_v21 = vpack.c.b16 %v659_v11, %v659_v11  ;;  %v676_v23 = vpack.c.b16 %v660_v15, %v660_v15  ;;  %v2947_v7 = vld [vmem:[%s3069_s29 + $0x328] sm:$0xff] }
  0x27   : > { %1477 = vmatpush.bf16.msra.mxu0 %v2847_v24  ;;  %v2916_v24 = vld [vmem:[%s3069_s29 + $0x230] sm:$0xff]  ;;  %v2914_v32 = vld [vmem:[%s3069_s29 + $0x220] sm:$0xff]  ;;  %v2913_v36 = vld [vmem:[%s3069_s29 + $0x218] sm:$0xff] }
  0x28   : > { %1490 = vmatpush.bf16.msra.mxu1 %v2855_v25  ;;  %v2924_v25 = vld [vmem:[%s3069_s29 + $0x270] sm:$0xff]  ;;  %v2922_v33 = vld [vmem:[%s3069_s29 + $0x260] sm:$0xff]  ;;  %v2921_v37 = vld [vmem:[%s3069_s29 + $0x258] sm:$0xff] }
  0x29   : > { %1503 = vmatpush.bf16.msra.mxu2 %v2863_v26  ;;  %v2932_v26 = vld [vmem:[%s3069_s29 + $0x2b0] sm:$0xff]  ;;  %v1683_v6 = vld [vmem:[%s359_s17] sm:$0xff]  ;;  %v2971_v10 = vld [vmem:[%s3069_s29 + $0x3e8] sm:$0xff] }
  0x2a   : > { %1516 = vmatpush.bf16.msra.mxu3 %v2871_v27  ;;  %v2940_v27 = vld [vmem:[%s3069_s29 + $0x2f0] sm:$0xff]  ;;  %1685 = vrot.lane.b32.xlu0 %v1683_v6, %s3012_s18  ;;  %v2946_v11 = vld [vmem:[%s3069_s29 + $0x320] sm:$0xff]  ;;  %v2945_v15 = vld [vmem:[%s3069_s29 + $0x318] sm:$0xff] }
  0x2b   : > { %1478 = vmatpush.bf16.msra.mxu0 %v2846_v30  ;;  %v2931_v30 = vld [vmem:[%s3069_s29 + $0x2a8] sm:$0xff]  ;;  %v2970_v14 = vld [vmem:[%s3069_s29 + $0x3e0] sm:$0xff] }
  0x2c   : > { %1491 = vmatpush.bf16.msra.mxu1 %v2854_v31  ;;  %v2939_v31 = vld [vmem:[%s3069_s29 + $0x2e8] sm:$0xff] }
  0x2d   : > { %1504 = vmatpush.bf16.msra.mxu2 %v2862_v34  ;;  %v2930_v34 = vld [vmem:[%s3069_s29 + $0x2a0] sm:$0xff] }
  0x2e   : > { %1517 = vmatpush.bf16.msra.mxu3 %v2870_v35  ;;  %1479 = vmatmul.bf16.vlgmr.msra.gmra.mxu0 %v671_v43  ;;  %v2938_v35 = vld [vmem:[%s3069_s29 + $0x2e0] sm:$0xff]  ;;  %v2936_v43 = vld [vmem:[%s3069_s29 + $0x2d0] sm:$0xff] }
  0x2f   : > { %1523 = vmatpush.bf16.msrb.mxu0 %v2885_v38  ;;  %1492 = vmatmul.bf16.vlgmr.msra.gmra.mxu1 %v672_v45  ;;  %v2929_v38 = vld [vmem:[%s3069_s29 + $0x298] sm:$0xff]  ;;  %v2919_v45 = vld [vmem:[%s3069_s29 + $0x248] sm:$0xff] }
  0x30   : > { %1536 = vmatpush.bf16.msrb.mxu1 %v2893_v39  ;;  %1505 = vmatmul.bf16.vlgmr.msra.gmra.mxu2 %v673_v42  ;;  %v2937_v39 = vld [vmem:[%s3069_s29 + $0x2d8] sm:$0xff]  ;;  %v2928_v42 = vld [vmem:[%s3069_s29 + $0x290] sm:$0xff] }
  0x31   : > { %1549 = vmatpush.bf16.msrb.mxu2 %v2901_v40  ;;  %1518 = vmatmul.bf16.vlgmr.msra.gmra.mxu3 %v674_v44  ;;  %v2912_v40 = vld [vmem:[%s3069_s29 + $0x210] sm:$0xff]  ;;  %v2911_v44 = vld [vmem:[%s3069_s29 + $0x208] sm:$0xff] }
  0x32   : > { %1562 = vmatpush.bf16.msrb.mxu3 %v2909_v41  ;;  %v2920_v41 = vld [vmem:[%s3069_s29 + $0x250] sm:$0xff] }
  0x33   : > { %1524 = vmatpush.bf16.msrb.mxu0 %v2884_v46  ;;  %v2927_v46 = vld [vmem:[%s3069_s29 + $0x288] sm:$0xff] }
  0x34   : > { %1537 = vmatpush.bf16.msrb.mxu1 %v2892_v47  ;;  %v2935_v47 = vld [vmem:[%s3069_s29 + $0x2c8] sm:$0xff] }
  0x35   : > { %1550 = vmatpush.bf16.msrb.mxu2 %v2900_v48  ;;  %v383_v48 = vld [vmem:[%s3103_s13 + $0x20] sm:$0xff] }
  0x36   : > { %1563 = vmatpush.bf16.msrb.mxu3 %v2908_v49  ;;  %v384_v49 = vld [vmem:[%s3103_s13 + $0x28] sm:$0xff] }
  0x37   : > { %1525 = vmatpush.bf16.msrb.mxu0 %v2883_v50  ;;  %v2910_v50 = vld [vmem:[%s3069_s29 + $0x200] sm:$0xff] }
  0x38   : > { %1538 = vmatpush.bf16.msrb.mxu1 %v2891_v51  ;;  %v2918_v51 = vld [vmem:[%s3069_s29 + $0x240] sm:$0xff] }
  0x39   : > { %1551 = vmatpush.bf16.msrb.mxu2 %v2899_v52  ;;  %v663_v52 = vunpack.c.l.b16 %v383_v48 }
  0x3a   : > { %1564 = vmatpush.bf16.msrb.mxu3 %v2907_v53  ;;  %v665_v53 = vunpack.c.l.b16 %v384_v49 }
  0x3b   : > { %1526 = vmatpush.bf16.msrb.mxu0 %v2882_v54  ;;  %v2926_v54 = vld [vmem:[%s3069_s29 + $0x280] sm:$0xff] }
  0x3c   : > { %1539 = vmatpush.bf16.msrb.mxu1 %v2890_v55  ;;  %v2934_v55 = vld [vmem:[%s3069_s29 + $0x2c0] sm:$0xff] }
  0x3d   : > { %1552 = vmatpush.bf16.msrb.mxu2 %v2898_v56  ;;  %v664_v56 = vunpack.c.h.b16 %v383_v48 }
  0x3e   : > { %1565 = vmatpush.bf16.msrb.mxu3 %v2906_v57  ;;  %v666_v57 = vunpack.c.h.b16 %v384_v49 }
  0x3f   : > { %1527 = vmatpush.bf16.msrb.mxu0 %v2881_v58  ;;  %v2949_v58 = vld [vmem:[%s3069_s29 + $0x338] sm:$0xff] }
  0x40   : > { %1540 = vmatpush.bf16.msrb.mxu1 %v2889_v59  ;;  %v2957_v59 = vld [vmem:[%s3069_s29 + $0x378] sm:$0xff] }
  0x41   : > { %1553 = vmatpush.bf16.msrb.mxu2 %v2897_v60  ;;  %v2965_v60 = vld [vmem:[%s3069_s29 + $0x3b8] sm:$0xff] }
  0x42   : > { %1566 = vmatpush.bf16.msrb.mxu3 %v2905_v61  ;;  %v2973_v61 = vld [vmem:[%s3069_s29 + $0x3f8] sm:$0xff] }
  0x43   : > { %1528 = vmatpush.bf16.msrb.mxu0 %v2880_v62  ;;  %v679_v62 = vpack.c.b16 %v663_v52, %v663_v52 }
  0x44   : > { %1541 = vmatpush.bf16.msrb.mxu1 %v2888_v63  ;;  %v681_v63 = vpack.c.b16 %v665_v53, %v665_v53 }
  0x45   : > { %1554 = vmatpush.bf16.msrb.mxu2 %v2896_v0  ;;  %v680_v0 = vpack.c.b16 %v664_v56, %v664_v56 }
  0x46   : > { %1567 = vmatpush.bf16.msrb.mxu3 %v2904_v1  ;;  %v682_v1 = vpack.c.b16 %v666_v57, %v666_v57 }
  0x47   : > { %1529 = vmatpush.bf16.msrb.mxu0 %v2879_v2  ;;  %v2948_v2 = vld [vmem:[%s3069_s29 + $0x330] sm:$0xff] }
  0x48   : > { %1542 = vmatpush.bf16.msrb.mxu1 %v2887_v3  ;;  %v2956_v3 = vld [vmem:[%s3069_s29 + $0x370] sm:$0xff] }
  0x49   : > { %1555 = vmatpush.bf16.msrb.mxu2 %v2895_v4  ;;  %v2964_v4 = vld [vmem:[%s3069_s29 + $0x3b0] sm:$0xff] }
  0x4a   : > { %1568 = vmatpush.bf16.msrb.mxu3 %v2903_v5  ;;  %v2972_v5 = vld [vmem:[%s3069_s29 + $0x3f0] sm:$0xff] }
  0x4b   : > { %1530 = vmatpush.bf16.msrb.mxu0 %v2878_v8  ;;  %v2955_v8 = vld [vmem:[%s3069_s29 + $0x368] sm:$0xff] }
  0x4c   : > { %1543 = vmatpush.bf16.msrb.mxu1 %v2886_v9  ;;  %v2963_v9 = vld [vmem:[%s3069_s29 + $0x3a8] sm:$0xff] }
  0x4d   : > { %1556 = vmatpush.bf16.msrb.mxu2 %v2894_v12  ;;  %v2954_v12 = vld [vmem:[%s3069_s29 + $0x360] sm:$0xff] }
  0x4e   : > { %1569 = vmatpush.bf16.msrb.mxu3 %v2902_v13  ;;  %1531 = vmatmul.bf16.vlgmr.msrb.gmra.mxu0 %v675_v21  ;;  %v2962_v13 = vld [vmem:[%s3069_s29 + $0x3a0] sm:$0xff]  ;;  %v2960_v21 = vld [vmem:[%s3069_s29 + $0x390] sm:$0xff] }
  0x4f   : > { %1575 = vmatpush.bf16.msra.mxu0 %v2917_v16  ;;  %1544 = vmatmul.bf16.vlgmr.msrb.gmra.mxu1 %v676_v23  ;;  %v2953_v16 = vld [vmem:[%s3069_s29 + $0x358] sm:$0xff]  ;;  %v2943_v23 = vld [vmem:[%s3069_s29 + $0x308] sm:$0xff] }
  0x50   : > { %1588 = vmatpush.bf16.msra.mxu1 %v2925_v17  ;;  %1557 = vmatmul.bf16.vlgmr.msrb.gmra.mxu2 %v677_v20  ;;  %v2961_v17 = vld [vmem:[%s3069_s29 + $0x398] sm:$0xff]  ;;  %v2952_v20 = vld [vmem:[%s3069_s29 + $0x350] sm:$0xff] }
  0x51   : > { %1601 = vmatpush.bf16.msra.mxu2 %v2933_v18  ;;  %1570 = vmatmul.bf16.vlgmr.msrb.gmra.mxu3 %v678_v22  ;;  %v2969_v18 = vld [vmem:[%s3069_s29 + $0x3d8] sm:$0xff]  ;;  %v2968_v22 = vld [vmem:[%s3069_s29 + $0x3d0] sm:$0xff] }
  0x52   : > { %1614 = vmatpush.bf16.msra.mxu3 %v2941_v19  ;;  %v2944_v19 = vld [vmem:[%s3069_s29 + $0x310] sm:$0xff] }
  0x53   : > { %1576 = vmatpush.bf16.msra.mxu0 %v2916_v24  ;;  %v2951_v24 = vld [vmem:[%s3069_s29 + $0x348] sm:$0xff] }
  0x54   : > { %1589 = vmatpush.bf16.msra.mxu1 %v2924_v25  ;;  %v385_v25 = vld [vmem:[%s3103_s13 + $0x30] sm:$0xff] }
  0x55   : > { %1602 = vmatpush.bf16.msra.mxu2 %v2932_v26  ;;  %v2959_v26 = vld [vmem:[%s3069_s29 + $0x388] sm:$0xff] }
  0x56   : > { %1615 = vmatpush.bf16.msra.mxu3 %v2940_v27  ;;  %v2967_v27 = vld [vmem:[%s3069_s29 + $0x3c8] sm:$0xff] }
  0x57   : > { %1577 = vmatpush.bf16.msra.mxu0 %v2915_v28  ;;  %v386_v28 = vld [vmem:[%s3103_s13 + $0x38] sm:$0xff] }
  0x58   : > { %1590 = vmatpush.bf16.msra.mxu1 %v2923_v29  ;;  %v667_v29 = vunpack.c.l.b16 %v385_v25 }
  0x59   : > { %1603 = vmatpush.bf16.msra.mxu2 %v2931_v30  ;;  %v668_v30 = vunpack.c.h.b16 %v385_v25 }
  0x5a   : > { %1616 = vmatpush.bf16.msra.mxu3 %v2939_v31  ;;  %v2942_v31 = vld [vmem:[%s3069_s29 + $0x300] sm:$0xff] }
  0x5b   : > { %1578 = vmatpush.bf16.msra.mxu0 %v2914_v32  ;;  %v2950_v32 = vld [vmem:[%s3069_s29 + $0x340] sm:$0xff] }
  0x5c   : > { %1591 = vmatpush.bf16.msra.mxu1 %v2922_v33  ;;  %v669_v33 = vunpack.c.l.b16 %v386_v28 }
  0x5d   : > { %1604 = vmatpush.bf16.msra.mxu2 %v2930_v34  ;;  %v670_v34 = vunpack.c.h.b16 %v386_v28 }
  0x5e   : > { %1617 = vmatpush.bf16.msra.mxu3 %v2938_v35  ;;  %v2958_v35 = vld [vmem:[%s3069_s29 + $0x380] sm:$0xff] }
  0x5f   : > { %1579 = vmatpush.bf16.msra.mxu0 %v2913_v36  ;;  %v2966_v36 = vld [vmem:[%s3069_s29 + $0x3c0] sm:$0xff] }
  0x60   : > { %1592 = vmatpush.bf16.msra.mxu1 %v2921_v37  ;;  %v683_v37 = vpack.c.b16 %v667_v29, %v667_v29 }
  0x61   : > { %1605 = vmatpush.bf16.msra.mxu2 %v2929_v38  ;;  %v684_v38 = vpack.c.b16 %v668_v30, %v668_v30 }
  0x62   : > { %1618 = vmatpush.bf16.msra.mxu3 %v2937_v39  ;;  %v685_v39 = vpack.c.b16 %v669_v33, %v669_v33  ;;  %v2983_v33 = vld [vmem:[%s3237_s28 + $0x44] sm:$0xf0] }
  0x63   : > { %1580 = vmatpush.bf16.msra.mxu0 %v2912_v40  ;;  %v686_v40 = vpack.c.b16 %v670_v34, %v670_v34  ;;  %v2975_v34 = vld [vmem:[%s3237_s28 + $0xc] sm:$0xf] }
  0x64   : > { %1593 = vmatpush.bf16.msra.mxu1 %v2920_v41  ;;  %v3001_v41 = vld [vmem:[%s355_s10] ss:$0 sm:$0xff] }
  0x65   : > { %1606 = vmatpush.bf16.msra.mxu2 %v2928_v42 }
  0x66   : > { %1619 = vmatpush.bf16.msra.mxu3 %v2936_v43 }
  0x67   : > { %1581 = vmatpush.bf16.msra.mxu0 %v2911_v44 }
  0x68   : > { %1594 = vmatpush.bf16.msra.mxu1 %v2919_v45 }
  0x69   : > { %1607 = vmatpush.bf16.msra.mxu2 %v2927_v46 }
  0x6a   : > { %1620 = vmatpush.bf16.msra.mxu3 %v2935_v47 }
  0x6b   : > { %1582 = vmatpush.bf16.msra.mxu0 %v2910_v50 }
  0x6c   : > { %1595 = vmatpush.bf16.msra.mxu1 %v2918_v51 }
  0x6d   : > { %1608 = vmatpush.bf16.msra.mxu2 %v2926_v54 }
  0x6e   : > { %1621 = vmatpush.bf16.msra.mxu3 %v2934_v55  ;;  %1583 = vmatmul.bf16.vlgmr.msra.gmra.mxu0 %v679_v62 }
  0x6f   : > { %1627 = vmatpush.bf16.msrb.mxu0 %v2949_v58  ;;  %1596 = vmatmul.bf16.vlgmr.msra.gmra.mxu1 %v680_v0 }
  0x70   : > { %1640 = vmatpush.bf16.msrb.mxu1 %v2957_v59  ;;  %1609 = vmatmul.bf16.vlgmr.msra.gmra.mxu2 %v681_v63 }
  0x71   : > { %1653 = vmatpush.bf16.msrb.mxu2 %v2965_v60  ;;  %1622 = vmatmul.bf16.vlgmr.msra.gmra.mxu3 %v682_v1 }
  0x72   : > { %1666 = vmatpush.bf16.msrb.mxu3 %v2973_v61 }
  0x73   : > { %1628 = vmatpush.bf16.msrb.mxu0 %v2948_v2 }
  0x74   : > { %1641 = vmatpush.bf16.msrb.mxu1 %v2956_v3 }
  0x75   : > { %1654 = vmatpush.bf16.msrb.mxu2 %v2964_v4 }
  0x76   : > { %1667 = vmatpush.bf16.msrb.mxu3 %v2972_v5 }
  0x77   : > { %1629 = vmatpush.bf16.msrb.mxu0 %v2947_v7 }
  0x78   : > { %1642 = vmatpush.bf16.msrb.mxu1 %v2955_v8 }
  0x79   : > { %1655 = vmatpush.bf16.msrb.mxu2 %v2963_v9 }
  0x7a   : > { %1668 = vmatpush.bf16.msrb.mxu3 %v2971_v10 }
  0x7b   : > { %1630 = vmatpush.bf16.msrb.mxu0 %v2946_v11 }
  0x7c   : > { %1643 = vmatpush.bf16.msrb.mxu1 %v2954_v12 }
  0x7d   : > { %1656 = vmatpush.bf16.msrb.mxu2 %v2962_v13 }
  0x7e   : > { %1669 = vmatpush.bf16.msrb.mxu3 %v2970_v14 }
  0x7f   : > { %1631 = vmatpush.bf16.msrb.mxu0 %v2945_v15 }
  0x80   : > { %1644 = vmatpush.bf16.msrb.mxu1 %v2953_v16 }
  0x81   : > { %1657 = vmatpush.bf16.msrb.mxu2 %v2961_v17 }
  0x82   : > { %1670 = vmatpush.bf16.msrb.mxu3 %v2969_v18 }
  0x83   : > { %1632 = vmatpush.bf16.msrb.mxu0 %v2944_v19 }
  0x84   : > { %1645 = vmatpush.bf16.msrb.mxu1 %v2952_v20 }
  0x85   : > { %1658 = vmatpush.bf16.msrb.mxu2 %v2960_v21 }
  0x86   : > { %1671 = vmatpush.bf16.msrb.mxu3 %v2968_v22 }
  0x87   : > { %1633 = vmatpush.bf16.msrb.mxu0 %v2943_v23 }
  0x88   : > { %1646 = vmatpush.bf16.msrb.mxu1 %v2951_v24 }
  0x89   : > { %1659 = vmatpush.bf16.msrb.mxu2 %v2959_v26 }
  0x8a   : > { %1672 = vmatpush.bf16.msrb.mxu3 %v2967_v27 }
  0x8b   : > { %1634 = vmatpush.bf16.msrb.mxu0 %v2942_v31 }
  0x8c   : > { %1647 = vmatpush.bf16.msrb.mxu1 %v2950_v32  ;;  %v2770_v32 = vld [vmem:[%s3237_s28 + $0x8] sm:$0xf] }
  0x8d   : > { %1660 = vmatpush.bf16.msrb.mxu2 %v2958_v35  ;;  %v2771_v35 = vor.u32 %v2983_v33, %v2770_v32 }
  0x8e   : > { %1673 = vmatpush.bf16.msrb.mxu3 %v2966_v36  ;;  %1635 = vmatmul.bf16.vlgmr.msrb.gmra.mxu0 %v683_v37  ;;  %v2772_v36 = vld [vmem:[%s3237_s28 + $0x48] sm:$0xf0]  ;;  %v2762_v37 = vld [vmem:[%s3237_s28] sm:$0xf] }
  0x8f   : > { %1648 = vmatmul.bf16.vlgmr.msrb.gmra.mxu1 %v684_v38  ;;  %v2982_v38 = vld [vmem:[%s3237_s28 + $0x3c] sm:$0xf0] }
  0x90   : > { %1661 = vmatmul.bf16.vlgmr.msrb.gmra.mxu2 %v685_v39  ;;  %v2775_v39 = vor.u32 %v2975_v34, %v2772_v36 }
  0x91   : > { %1674 = vmatmul.bf16.vlgmr.msrb.gmra.mxu3 %v686_v40  ;;  %v2763_v40 = vor.u32 %v2982_v38, %v2762_v37  ;;  %1864 = vmatpush.bf16.msra.mxu2 %v2771_v35 }
  0x92   : > { %1877 = vmatpush.bf16.msra.mxu3 %v2775_v39 }
  0x93   : > { %1838 = vmatpush.bf16.msra.mxu0 %v2763_v40 }
  0x9c   : > { %v1686_v28 = vpop.permute.xlu0 %1685 }
  0xab   : > { %v1480_v42 = vpop.f32.mrf.mxu0 }
  0xac   : > { %v1481_v43 = vadd.f32 %v3001_v41, %v1480_v42  ;;  %v1493_v44 = vpop.f32.mrf.mxu1  ;;  %v2974_v41 = vld [vmem:[%s3237_s28 + $0x4] sm:$0xf] }
  0xad   : > { %v2764_v42 = vld [vmem:[%s3237_s28 + $0x40] sm:$0xf0] }
  0xae   : > { %v1494_v45 = vadd.f32 %v1493_v44, %v1481_v43  ;;  %v2767_v43 = vor.u32 %v2974_v41, %v2764_v42  ;;  %v2786_v44 = vld [vmem:[%s3237_s28 + $0x18] sm:$0xf] }
  0xb0   : > { %1851 = vmatpush.bf16.msra.mxu1 %v2767_v43 }
  0xb3   : > { %v1506_v46 = vpop.f32.mrf.mxu2  ;;  %v1482_v49 = vpop.f32.mrf.mxu0 }
  0xb4   : > { %v1507_v47 = vadd.f32 %v1506_v46, %v1494_v45  ;;  %v1519_v48 = vpop.f32.mrf.mxu3  ;;  %v1495_v51 = vpop.f32.mrf.mxu1  ;;  %v2985_v45 = vld [vmem:[%s3237_s28 + $0x54] sm:$0xf0]  ;;  %v2977_v46 = vld [vmem:[%s3237_s28 + $0x1c] sm:$0xf]  ;;  %v2778_v49 = vld [vmem:[%s3237_s28 + $0x10] sm:$0xf] }
  0xb6   : > { %v1520_v50 = vadd.f32 %v1519_v48, %v1507_v47  ;;  %v2787_v47 = vor.u32 %v2985_v45, %v2786_v44  ;;  %v2788_v48 = vld [vmem:[%s3237_s28 + $0x58] sm:$0xf0] }
  0xb7   : > { %v2791_v51 = vor.u32 %v2977_v46, %v2788_v48 }
  0xb8   : > { %1916 = vmatpush.bf16.msrb.mxu2 %v2787_v47 }
  0xb9   : > { %1929 = vmatpush.bf16.msrb.mxu3 %v2791_v51 }
  0xbb   : > { %v1508_v52 = vpop.f32.mrf.mxu2 }
  0xbc   : > { %v1521_v53 = vpop.f32.mrf.mxu3 }
  0xbd   : > { %v2976_v53 = vld [vmem:[%s3237_s28 + $0x14] sm:$0xf] }
  0xcb   : > { %v1532_v54 = vpop.f32.mrf.mxu0 }
  0xcc   : > { %v1545_v55 = vpop.f32.mrf.mxu1  ;;  %v1533_v0 = vadd.f32 %v1532_v54, %v1520_v50  ;;  %v2984_v50 = vld [vmem:[%s3237_s28 + $0x4c] sm:$0xf0]  ;;  %v2780_v54 = vld [vmem:[%s3237_s28 + $0x50] sm:$0xf0] }
  0xcd   : > { %v2779_v52 = vor.u32 %v2984_v50, %v2778_v49 }
  0xce   : > { %v1546_v4 = vadd.f32 %v1545_v55, %v1533_v0  ;;  %v2783_v55 = vor.u32 %v2976_v53, %v2780_v54  ;;  %v2986_v0 = vld [vmem:[%s3237_s28 + $0x5c] sm:$0xf0] }
  0xcf   : > { %1890 = vmatpush.bf16.msrb.mxu0 %v2779_v52 }
  0xd0   : > { %1903 = vmatpush.bf16.msrb.mxu1 %v2783_v55 }
  0xd3   : > { %v1558_v56 = vpop.f32.mrf.mxu2  ;;  %v1534_v58 = vpop.f32.mrf.mxu0 }
  0xd4   : > { %v1571_v57 = vpop.f32.mrf.mxu3  ;;  %v1547_v59 = vpop.f32.mrf.mxu1  ;;  %v1559_v6 = vadd.f32 %v1558_v56, %v1546_v4  ;;  %v2987_v58 = vld [vmem:[%s3237_s28 + $0x64] sm:$0xf0] }
  0xd6   : > { %v1572_v9 = vadd.f32 %v1571_v57, %v1559_v6  ;;  %v2802_v57 = vld [vmem:[%s3237_s28 + $0x28] sm:$0xf] }
  0xd7   : > { %v2803_v6 = vor.u32 %v2987_v58, %v2802_v57 }
  0xdb   : > { %v1560_v60 = vpop.f32.mrf.mxu2 }
  0xdc   : > { %v1573_v61 = vpop.f32.mrf.mxu3  ;;  %v2979_v60 = vld [vmem:[%s3237_s28 + $0x2c] sm:$0xf] }
  0xdd   : > { %v2804_v61 = vld [vmem:[%s3237_s28 + $0x68] sm:$0xf0] }
  0xeb   : > { %v1584_v62 = vpop.f32.mrf.mxu0 }
  0xec   : > { %v1597_v63 = vpop.f32.mrf.mxu1  ;;  %v1585_v10 = vadd.f32 %v1584_v62, %v1572_v9  ;;  %v2794_v62 = vld [vmem:[%s3237_s28 + $0x20] sm:$0xf] }
  0xee   : > { %v1598_v11 = vadd.f32 %v1597_v63, %v1585_v10  ;;  %v2795_v10 = vor.u32 %v2986_v0, %v2794_v62  ;;  %v1712_v0 = vld [vmem:[%s3298_s12 + $0x8] sm:$0xff] }
  0xf3   : > { %v1610_v1 = vpop.f32.mrf.mxu2  ;;  %v1586_v3 = vpop.f32.mrf.mxu0 }
  0xf4   : > { %v1623_v2 = vpop.f32.mrf.mxu3  ;;  %v1599_v5 = vpop.f32.mrf.mxu1  ;;  %v1611_v12 = vadd.f32 %v1610_v1, %v1598_v11  ;;  %v2978_v1 = vld [vmem:[%s3237_s28 + $0x24] sm:$0xf] }
  0xf6   : > { %v1624_v13 = vadd.f32 %v1623_v2, %v1611_v12  ;;  %v2796_v2 = vld [vmem:[%s3237_s28 + $0x60] sm:$0xf0] }
  0xf7   : > { %v2799_v11 = vor.u32 %v2978_v1, %v2796_v2  ;;  %v1723_v1 = vperm.slane %v1712_v0, 0  ;;  %v1724_v2 = vperm.slane %v1712_v0, 1 }
  0xfb   : > { %v1612_v7 = vpop.f32.mrf.mxu2 }
  0xfc   : > { %v1625_v8 = vpop.f32.mrf.mxu3  ;;  %v2807_v7 = vor.u32 %v2979_v60, %v2804_v61 }
 0x10b   : > { %v1636_v14 = vpop.f32.mrf.mxu0 }
 0x10c   : > { %v1649_v15 = vpop.f32.mrf.mxu1  ;;  %v1637_v16 = vadd.f32 %v1636_v14, %v1624_v13  ;;  %v2818_v13 = vld [vmem:[%s3237_s28 + $0x38] sm:$0xf] }
 0x10d   : > { %v2989_v14 = vld [vmem:[%s3237_s28 + $0x74] sm:$0xf0] }
 0x10e   : > { %v1650_v17 = vadd.f32 %v1649_v15, %v1637_v16  ;;  %v2981_v15 = vld [vmem:[%s3237_s28 + $0x3c] sm:$0xf] }
 0x10f   : > { %v2820_v16 = vld [vmem:[%s3237_s28 + $0x78] sm:$0xf0] }
 0x113   : > { %v1662_v18 = vpop.f32.mrf.mxu2  ;;  %v1638_v21 = vpop.f32.mrf.mxu0 }
 0x114   : > { %v1675_v19 = vpop.f32.mrf.mxu3  ;;  %v1663_v20 = vadd.f32 %v1662_v18, %v1650_v17  ;;  %v1651_v22 = vpop.f32.mrf.mxu1  ;;  %v2810_v17 = vld [vmem:[%s3237_s28 + $0x30] sm:$0xf]  ;;  %v2819_v21 = vor.u32 %v2989_v14, %v2818_v13 }
 0x115   : > { %v2988_v18 = vld [vmem:[%s3237_s28 + $0x6c] sm:$0xf0]  ;;  %v2823_v22 = vor.u32 %v2981_v15, %v2820_v16 }
 0x116   : > { %v1676_v23 = vadd.f32 %v1675_v19, %v1663_v20  ;;  %v2980_v19 = vld [vmem:[%s3237_s28 + $0x34] sm:$0xf] }
 0x117   : > { %v2812_v20 = vld [vmem:[%s3237_s28 + $0x70] sm:$0xf0] }
 0x118   : > { %2079 = vrot.lane.b32.xlu2 %v1676_v23, %s3013_s21  ;;  %2072 = vrot.lane.b32.xlu1 %v1676_v23, %s3012_s18  ;;  %v1679_v24 = vmul.f32 0.5, %v1676_v23 }
 0x11a   : > { %v1680_v25 = vmul.f32 1.442695, %v1679_v24  ;;  %v2815_v24 = vor.u32 %v2980_v19, %v2812_v20 }
 0x11b   : > { %v1664_v26 = vpop.f32.mrf.mxu2 }
 0x11c   : > { %v1677_v27 = vpop.f32.mrf.mxu3  ;;  %3002 = vpow2.f32 %v1680_v25  ;;  %v1711_v25 = vld [vmem:[%s3298_s12] sm:$0xff] }
 0x11d   : > { %v1715_v26 = vperm.slane %v1711_v25, 0  ;;  %v1716_v27 = vperm.slane %v1711_v25, 1  ;;  %v1717_v34 = vperm.slane %v1711_v25, 2  ;;  %v1718_v35 = vperm.slane %v1711_v25, 3 }
 0x11e   : > { %v1719_v44 = vperm.slane %v1711_v25, 4  ;;  %v1720_v45 = vperm.slane %v1711_v25, 5  ;;  %v1721_v54 = vperm.slane %v1711_v25, 6  ;;  %v1722_v55 = vperm.slane %v1711_v25, 7 }
 0x122   : > { %v3003_v29 = vpop.eup %3002 }
 0x123   : > { %v1688_v30 = vmul.f32 %v3003_v29, %v1686_v28  ;;  %v1682_v31 = vmul.f32 %v3003_v29, %v3003_v29 }
 0x125   : > { %1690 = vrot.lane.b32.xlu0 %v1688_v30, %s3014_s22  ;;  %2076 = vrot.lane.b32.xlu1 %v1682_v31, %s3012_s18 }
 0x172   : > { %v2080_v8 = vpop.permute.xlu2 %2079 }
 0x18a   : > { %v2073_v56 = vpop.permute.xlu1 %2072 }
 0x197   : > { %v1691_v59 = vpop.permute.xlu0 %1690  ;;  %v2077_v5 = vpop.permute.xlu1 %2076 }
 0x198   : > { %v1693_v63 = vadd.f32 %v1691_v59, %v1676_v23  ;;  %v2811_v23 = vor.u32 %v2988_v18, %v2810_v17 }
 0x19a   : > { %v1694_v3 = vpack.c.bf16 %v1693_v63, %v1693_v63  ;;  %v2082_v4 = vsel %vm1827_vm0, %v1693_v63, %v2073_v56 }
 0x19b   : > { %v2084_v9 = vsel %vm2083_vm1, %v2082_v4, %v2077_v5 }
 0x19c   : > { %v2086_v12 = vsel %vm2085_vm2, %v2084_v9, %v2080_v8  ;;  %2824 = vmatmul.msk.bf16.vlgmr.msra.gmra.mxu0 %vm1827_vm0, %v1694_v3  ;;  %2825 = vmatmul.msk.bf16.vlgmr.msra.gmra.mxu1 %vm1827_vm0, %v1694_v3 }
 0x19d   : > { %2088 = vst.msk [vmem:[%s377_s8] sm:$0xff] %vm2087_vm3, %v2086_v12  ;;  %2826 = vmatmul.msk.bf16.vlgmr.msra.gmra.mxu2 %vm1827_vm0, %v1694_v3  ;;  %2827 = vmatmul.msk.bf16.vlgmr.msra.gmra.mxu3 %vm1827_vm0, %v1694_v3  ;;  %v1726_v12 = vperm.slane %v1712_v0, 3 }
 0x19e   : > { %1968 = vmatpush.bf16.msra.mxu2 %v2803_v6  ;;  %1981 = vmatpush.bf16.msra.mxu3 %v2807_v7 }
 0x19f   : > { %1942 = vmatpush.bf16.msra.mxu0 %v2795_v10  ;;  %1955 = vmatpush.bf16.msra.mxu1 %v2799_v11  ;;  %v1725_v11 = vperm.slane %v1712_v0, 2 }
 0x1ac   : > { %2828 = vmatmul.msk.bf16.vlgmr.msrb.gmra.mxu0 %vm1827_vm0, %v1694_v3  ;;  %2829 = vmatmul.msk.bf16.vlgmr.msrb.gmra.mxu1 %vm1827_vm0, %v1694_v3 }
 0x1ad   : > { %2830 = vmatmul.msk.bf16.vlgmr.msrb.gmra.mxu2 %vm1827_vm0, %v1694_v3  ;;  %2831 = vmatmul.msk.bf16.vlgmr.msrb.gmra.mxu3 %vm1827_vm0, %v1694_v3 }
 0x1ae   : > { %2020 = vmatpush.bf16.msrb.mxu2 %v2819_v21  ;;  %2033 = vmatpush.bf16.msrb.mxu3 %v2823_v22  ;;  %v1727_v21 = vperm.slane %v1712_v0, 4  ;;  %v1728_v22 = vperm.slane %v1712_v0, 5 }
 0x1af   : > { %1994 = vmatpush.bf16.msrb.mxu0 %v2811_v23  ;;  %2007 = vmatpush.bf16.msrb.mxu1 %v2815_v24 }
 0x1bc   : > { %2832 = vmatmul.msk.bf16.vlgmr.msra.gmra.mxu0 %vm1827_vm0, %v1694_v3  ;;  %2833 = vmatmul.msk.bf16.vlgmr.msra.gmra.mxu1 %vm1827_vm0, %v1694_v3 }
 0x1bd   : > { %2834 = vmatmul.msk.bf16.vlgmr.msra.gmra.mxu2 %vm1827_vm0, %v1694_v3  ;;  %2835 = vmatmul.msk.bf16.vlgmr.msra.gmra.mxu3 %vm1827_vm0, %v1694_v3 }
 0x1cc   : > { %2836 = vmatmul.msk.bf16.vlgmr.msrb.gmra.mxu0 %vm1827_vm0, %v1694_v3  ;;  %2837 = vmatmul.msk.bf16.vlgmr.msrb.gmra.mxu1 %vm1827_vm0, %v1694_v3 }
 0x1cd   : > { %2838 = vmatmul.msk.bf16.vlgmr.msrb.gmra.mxu2 %vm1827_vm0, %v1694_v3  ;;  %2839 = vmatmul.msk.bf16.vlgmr.msrb.gmra.mxu3 %vm1827_vm0, %v1694_v3 }
 0x219   : > { %v1840_v28 = vpop.f32.mrf.mxu0  ;;  %v1853_v29 = vpop.f32.mrf.mxu1 }
 0x21a   : > { %v1841_v30 = vadd.f32 %v1840_v28, %v1715_v26  ;;  %v1854_v31 = vadd.f32 %v1853_v29, %v1716_v27 }
 0x21c   : > { %v2039_v32 = vmax.f32 %v1841_v30, 0.0  ;;  %v2040_v33 = vmax.f32 %v1854_v31, 0.0  ;;  %v1729_v31 = vperm.slane %v1712_v0, 6 }
 0x21e   : > { %2055 = vst [vmem:[%s3306_s15] sm:$0xff] %v2039_v32  ;;  %v1730_v32 = vperm.slane %v1712_v0, 7 }
 0x21f   : > { %2056 = vst [vmem:[%s3306_s15 + $0x8] sm:$0xff] %v2040_v33 }
 0x220   : > { %v1866_v36 = vpop.f32.mrf.mxu2  ;;  %v1879_v37 = vpop.f32.mrf.mxu3 }
 0x221   : > { %v1867_v38 = vadd.f32 %v1866_v36, %v1717_v34  ;;  %v1880_v39 = vadd.f32 %v1879_v37, %v1718_v35  ;;  %v1842_v40 = vpop.f32.mrf.mxu0  ;;  %v1855_v41 = vpop.f32.mrf.mxu1 }
 0x223   : > { %v2041_v42 = vmax.f32 %v1867_v38, 0.0  ;;  %v2042_v43 = vmax.f32 %v1880_v39, 0.0 }
 0x225   : > { %2057 = vst [vmem:[%s3306_s15 + $0x10] sm:$0xff] %v2041_v42 }
 0x226   : > { %2058 = vst [vmem:[%s3306_s15 + $0x18] sm:$0xff] %v2042_v43 }
 0x228   : > { %v1868_v46 = vpop.f32.mrf.mxu2  ;;  %v1881_v47 = vpop.f32.mrf.mxu3 }
 0x229   : > { %v1892_v48 = vpop.f32.mrf.mxu0  ;;  %v1905_v49 = vpop.f32.mrf.mxu1 }
 0x22a   : > { %v1893_v50 = vadd.f32 %v1892_v48, %v1719_v44  ;;  %v1906_v51 = vadd.f32 %v1905_v49, %v1720_v45 }
 0x22c   : > { %v2043_v52 = vmax.f32 %v1893_v50, 0.0  ;;  %v2044_v53 = vmax.f32 %v1906_v51, 0.0 }
 0x22e   : > { %2059 = vst [vmem:[%s3306_s15 + $0x20] sm:$0xff] %v2043_v52 }
 0x22f   : > { %2060 = vst [vmem:[%s3306_s15 + $0x28] sm:$0xff] %v2044_v53 }
 0x230   : > { %v1918_v56 = vpop.f32.mrf.mxu2  ;;  %v1931_v57 = vpop.f32.mrf.mxu3 }
 0x231   : > { %v1919_v58 = vadd.f32 %v1918_v56, %v1721_v54  ;;  %v1932_v59 = vadd.f32 %v1931_v57, %v1722_v55  ;;  %v1894_v60 = vpop.f32.mrf.mxu0  ;;  %v1907_v61 = vpop.f32.mrf.mxu1 }
 0x233   : > { %v2045_v62 = vmax.f32 %v1919_v58, 0.0  ;;  %v2046_v63 = vmax.f32 %v1932_v59, 0.0 }
 0x235   : > { %2061 = vst [vmem:[%s3306_s15 + $0x30] sm:$0xff] %v2045_v62 }
 0x236   : > { %2062 = vst [vmem:[%s3306_s15 + $0x38] sm:$0xff] %v2046_v63 }
 0x238   : > { %v1920_v3 = vpop.f32.mrf.mxu2  ;;  %v1933_v4 = vpop.f32.mrf.mxu3 }
 0x239   : > { %v1944_v5 = vpop.f32.mrf.mxu0  ;;  %v1957_v6 = vpop.f32.mrf.mxu1 }
 0x23a   : > { %v1945_v7 = vadd.f32 %v1944_v5, %v1723_v1  ;;  %v1958_v8 = vadd.f32 %v1957_v6, %v1724_v2 }
 0x23c   : > { %v2047_v9 = vmax.f32 %v1945_v7, 0.0  ;;  %v2048_v10 = vmax.f32 %v1958_v8, 0.0 }
 0x23e   : > { %2063 = vst [vmem:[%s3306_s15 + $0x40] sm:$0xff] %v2047_v9 }
 0x23f   : > { %2064 = vst [vmem:[%s3306_s15 + $0x48] sm:$0xff] %v2048_v10 }
 0x240   : > { %v1970_v13 = vpop.f32.mrf.mxu2  ;;  %v1983_v14 = vpop.f32.mrf.mxu3 }
 0x241   : > { %v1971_v15 = vadd.f32 %v1970_v13, %v1725_v11  ;;  %v1984_v16 = vadd.f32 %v1983_v14, %v1726_v12  ;;  %v1946_v17 = vpop.f32.mrf.mxu0  ;;  %v1959_v18 = vpop.f32.mrf.mxu1 }
 0x243   : > { %v2049_v19 = vmax.f32 %v1971_v15, 0.0  ;;  %v2050_v20 = vmax.f32 %v1984_v16, 0.0 }
 0x245   : > { %2065 = vst [vmem:[%s3306_s15 + $0x50] sm:$0xff] %v2049_v19 }
 0x246   : > { %2066 = vst [vmem:[%s3306_s15 + $0x58] sm:$0xff] %v2050_v20 }
 0x248   : > { %v1972_v23 = vpop.f32.mrf.mxu2  ;;  %v1985_v24 = vpop.f32.mrf.mxu3 }
 0x249   : > { %v1996_v25 = vpop.f32.mrf.mxu0  ;;  %v2009_v26 = vpop.f32.mrf.mxu1 }
 0x24a   : > { %v1997_v27 = vadd.f32 %v1996_v25, %v1727_v21  ;;  %v2010_v28 = vadd.f32 %v2009_v26, %v1728_v22 }
 0x24c   : > { %v2051_v29 = vmax.f32 %v1997_v27, 0.0  ;;  %v2052_v30 = vmax.f32 %v2010_v28, 0.0 }
 0x24e   : > { %2067 = vst [vmem:[%s3306_s15 + $0x60] sm:$0xff] %v2051_v29 }
 0x24f   : > { %2068 = vst [vmem:[%s3306_s15 + $0x68] sm:$0xff] %v2052_v30 }
 0x250   : > { %v2022_v33 = vpop.f32.mrf.mxu2  ;;  %v2035_v34 = vpop.f32.mrf.mxu3 }
 0x251   : > { %v2023_v35 = vadd.f32 %v2022_v33, %v1729_v31  ;;  %v2036_v36 = vadd.f32 %v2035_v34, %v1730_v32  ;;  %v1998_v37 = vpop.f32.mrf.mxu0  ;;  %v2011_v38 = vpop.f32.mrf.mxu1 }
 0x253   : > { %v2053_v39 = vmax.f32 %v2023_v35, 0.0  ;;  %v2054_v40 = vmax.f32 %v2036_v36, 0.0 }
 0x255   : > { %2069 = vst [vmem:[%s3306_s15 + $0x70] sm:$0xff] %v2053_v39 }
 0x256   : > { %2070 = vst [vmem:[%s3306_s15 + $0x78] sm:$0xff] %v2054_v40 }
 0x258   : > { %v2024_v41 = vpop.f32.mrf.mxu2  ;;  %v2037_v42 = vpop.f32.mrf.mxu3 }
 0x259 PF: > { %s18_s24 = sadd.s32 1, %s3010_s24  }
 0x25a   : > { %p15_p4 = scmp.ge.s32.totalorder %s18_s24, 4  }
 0x25c   :  { %17 = sbr.rel (!%p15_p4) target bundleno = 1 (0x1), region = 101 }

// kernel: squeeze.8
= control target key start
LH: loop header
LB: loop body
LE: loop exit
PB: predicated region body
PF: predicated region fallthrough
CT: control target
= control target key end

     0   :  { %s281_s0 = inlined_call_operand.vmem [shape: f32[1,2,4,256], index: 0, kind: input, shape index: {}]   ;;  %s282_s1 = inlined_call_operand.hbm [shape: f32[2,4,16,16], index: 1, kind: output, shape index: {}]  }
   0x1   :  { %v177_v0 = vld [vmem:[%s281_s0 + $0x4] sm:$0xf]  ;;  %v17_v1 = vld [vmem:[%s281_s0] sm:$0xf]  ;;  %v175_v2 = vld [vmem:[%s281_s0 + $0xc] sm:$0xf] }
   0x2   :  { %16 = vst [vmem:[#allocation2 + $0x8] sm:$0xf] %v177_v0  ;;  %v176_v3 = vld [vmem:[%s281_s0 + $0x8] sm:$0xf] }
   0x3   :  { %18 = vst [vmem:[#allocation2] sm:$0xf] %v17_v1 }
   0x4   :  { %8 = vst [vmem:[#allocation2 + $0x18] sm:$0xf] %v175_v2 }
   0x5   :  { %2 = vsyncpa [#allocation1], 0  ;;  %12 = vst [vmem:[#allocation2 + $0x10] sm:$0xf] %v176_v3  ;;  %vm20_vm0 = vcmask 130048   ;;  %s212_s0 = smov 96  }
   0x6   :  { %s213_s14 = smov 112   ;;  %s214_s15 = smov 80  }
   0x7   :  { %s215_s16 = smov 64   ;;  %s216_s17 = smov 48  }
   0x8   :  { %s217_s18 = smov 32   ;;  %s218_s19 = smov 16  }
   0x9   :  { %v24_v4 = vld [vmem:[#allocation2 + $0x8] sm:$0xf]   ;;  %s219_s20 = smov [#allocation0]   ;;  %s168_s1 = sshll.u32 %s282_s1, 4  ;;  %s169_s1 = int_to_ptr.hbm [resolvable:$true] %s168_s1 }
   0xa   :  { %v61_v5 = vld.sshfl [vmem:[#allocation2] sm:$0xff pattern:$0xb3a29180]   ;;  %27 = vst.msk [vmem:[#allocation0 + $0x8] ss:$16 sm:$0x3] %vm20_vm0, %v24_v4  }
   0xb   :  { %v19_v6 = vld [vmem:[#allocation2] sm:$0xf]   ;;  %62 = vrot.lane.b32.xlu1 %v61_v5, %s212_s0  ;;  %45 = vrot.lane.b32.xlu0 %v61_v5, %s213_s14  ;;  %29 = vst.msk [vmem:[#allocation0 + $0x8] ss:$16 sm:$0xc] %vm20_vm0, %v24_v4   ;;  %s166_s21 = sshll.u32 %s219_s20, 4  ;;  %s167_s21 = int_to_ptr.vmem [resolvable:$true] %s166_s21 }
   0xc   :  { %21 = vst.msk [vmem:[#allocation0] ss:$16 sm:$0x3] %vm20_vm0, %v19_v6   ;;  %79 = vrot.lane.b32.xlu2 %v61_v5, %s214_s15  ;;  %v31_v7 = vld [vmem:[#allocation2 + $0x10] sm:$0xf]  }
   0xd   :  { %22 = vst.msk [vmem:[#allocation0] ss:$16 sm:$0xc] %vm20_vm0, %v19_v6   ;;  %v38_v8 = vld [vmem:[#allocation2 + $0x18] sm:$0xf]  }
   0xe   :  { %34 = vst.msk [vmem:[#allocation0 + $0x40] ss:$16 sm:$0x3] %vm20_vm0, %v31_v7   ;;  %v70_v9 = vld.sshfl [vmem:[#allocation2 + $0x10] sm:$0xff pattern:$0xb3a29180]  }
   0xf   :  { %36 = vst.msk [vmem:[#allocation0 + $0x40] ss:$16 sm:$0xc] %vm20_vm0, %v31_v7  }
  0x10   :  { %41 = vst.msk [vmem:[#allocation0 + $0x48] ss:$16 sm:$0x3] %vm20_vm0, %v38_v8  }
  0x11   :  { %43 = vst.msk [vmem:[#allocation0 + $0x48] ss:$16 sm:$0xc] %vm20_vm0, %v38_v8  }
  0x13   :  { %71 = vrot.lane.b32.xlu1 %v70_v9, %s212_s0  ;;  %54 = vrot.lane.b32.xlu0 %v70_v9, %s213_s14 }
  0x14   :  { %88 = vrot.lane.b32.xlu2 %v70_v9, %s214_s15 }
  0x1b   :  { %105 = vrot.lane.b32.xlu1 %v70_v9, %s215_s16  ;;  %96 = vrot.lane.b32.xlu0 %v61_v5, %s215_s16 }
  0x1c   :  { %113 = vrot.lane.b32.xlu2 %v61_v5, %s216_s17 }
  0x23   :  { %130 = vrot.lane.b32.xlu1 %v61_v5, %s217_s18  ;;  %122 = vrot.lane.b32.xlu0 %v70_v9, %s216_s17 }
  0x24   :  { %139 = vrot.lane.b32.xlu2 %v70_v9, %s217_s18 }
  0x2b   :  { %156 = vrot.lane.b32.xlu1 %v70_v9, %s218_s19  ;;  %147 = vrot.lane.b32.xlu0 %v61_v5, %s218_s19 }
  0x66   :  { %v80_v10 = vpop.permute.xlu2 %79  }
  0x67   :  { %83 = vst.msk [vmem:[#allocation0 + $0x3] ss:$8 sm:$0xf] %vm20_vm0, %v80_v10  }
  0x68   :  { %85 = vst.msk [vmem:[#allocation0 + $0x3] ss:$8 sm:$0xf0] %vm20_vm0, %v80_v10  }
  0x6e   :  { %v89_v11 = vpop.permute.xlu2 %88  }
  0x6f   :  { %92 = vst.msk [vmem:[#allocation0 + $0x43] ss:$8 sm:$0xf] %vm20_vm0, %v89_v11  }
  0x70   :  { %94 = vst.msk [vmem:[#allocation0 + $0x43] ss:$8 sm:$0xf0] %vm20_vm0, %v89_v11  }
  0x76   :  { %v114_v12 = vpop.permute.xlu2 %113  }
  0x77   :  { %117 = vst.msk [vmem:[#allocation0 + $0x5] ss:$8 sm:$0xf] %vm20_vm0, %v114_v12  }
  0x78   :  { %119 = vst.msk [vmem:[#allocation0 + $0x5] ss:$8 sm:$0xf0] %vm20_vm0, %v114_v12  }
  0x7d   :  { %v63_v13 = vpop.permute.xlu1 %62   ;;  %v46_v14 = vpop.permute.xlu0 %45  }
  0x7e   :  { %66 = vst.msk [vmem:[#allocation0 + $0x2] ss:$8 sm:$0xf] %vm20_vm0, %v63_v13   ;;  %v140_v15 = vpop.permute.xlu2 %139  }
  0x7f   :  { %68 = vst.msk [vmem:[#allocation0 + $0x2] ss:$8 sm:$0xf0] %vm20_vm0, %v63_v13  }
  0x80   :  { %49 = vst.msk [vmem:[#allocation0 + $0x1] ss:$8 sm:$0xf] %vm20_vm0, %v46_v14  }
  0x81   :  { %51 = vst.msk [vmem:[#allocation0 + $0x1] ss:$8 sm:$0xf0] %vm20_vm0, %v46_v14  }
  0x82   :  { %143 = vst.msk [vmem:[#allocation0 + $0x46] ss:$8 sm:$0xf] %vm20_vm0, %v140_v15  }
  0x83   :  { %145 = vst.msk [vmem:[#allocation0 + $0x46] ss:$8 sm:$0xf0] %vm20_vm0, %v140_v15  }
  0x85   :  { %v72_v16 = vpop.permute.xlu1 %71   ;;  %v55_v17 = vpop.permute.xlu0 %54  }
  0x86   :  { %75 = vst.msk [vmem:[#allocation0 + $0x42] ss:$8 sm:$0xf] %vm20_vm0, %v72_v16  }
  0x87   :  { %77 = vst.msk [vmem:[#allocation0 + $0x42] ss:$8 sm:$0xf0] %vm20_vm0, %v72_v16  }
  0x88   :  { %58 = vst.msk [vmem:[#allocation0 + $0x41] ss:$8 sm:$0xf] %vm20_vm0, %v55_v17  }
  0x89   :  { %60 = vst.msk [vmem:[#allocation0 + $0x41] ss:$8 sm:$0xf0] %vm20_vm0, %v55_v17  }
  0x8d   :  { %v106_v18 = vpop.permute.xlu1 %105   ;;  %v97_v19 = vpop.permute.xlu0 %96  }
  0x8e   :  { %109 = vst.msk [vmem:[#allocation0 + $0x44] ss:$8 sm:$0xf] %vm20_vm0, %v106_v18  }
  0x8f   :  { %111 = vst.msk [vmem:[#allocation0 + $0x44] ss:$8 sm:$0xf0] %vm20_vm0, %v106_v18  }
  0x90   :  { %100 = vst.msk [vmem:[#allocation0 + $0x4] ss:$8 sm:$0xf] %vm20_vm0, %v97_v19  }
  0x91   :  { %102 = vst.msk [vmem:[#allocation0 + $0x4] ss:$8 sm:$0xf0] %vm20_vm0, %v97_v19  }
  0x95   :  { %v131_v20 = vpop.permute.xlu1 %130   ;;  %v123_v21 = vpop.permute.xlu0 %122  }
  0x96   :  { %134 = vst.msk [vmem:[#allocation0 + $0x6] ss:$8 sm:$0xf] %vm20_vm0, %v131_v20  }
  0x97   :  { %136 = vst.msk [vmem:[#allocation0 + $0x6] ss:$8 sm:$0xf0] %vm20_vm0, %v131_v20  }
  0x98   :  { %126 = vst.msk [vmem:[#allocation0 + $0x45] ss:$8 sm:$0xf] %vm20_vm0, %v123_v21  }
  0x99   :  { %128 = vst.msk [vmem:[#allocation0 + $0x45] ss:$8 sm:$0xf0] %vm20_vm0, %v123_v21  }
  0x9d   :  { %v157_v22 = vpop.permute.xlu1 %156   ;;  %v148_v23 = vpop.permute.xlu0 %147  }
  0x9e   :  { %160 = vst.msk [vmem:[#allocation0 + $0x47] ss:$8 sm:$0xf] %vm20_vm0, %v157_v22  }
  0x9f   :  { %162 = vst.msk [vmem:[#allocation0 + $0x47] ss:$8 sm:$0xf0] %vm20_vm0, %v157_v22  }
  0xa0   :  { %151 = vst.msk [vmem:[#allocation0 + $0x7] ss:$8 sm:$0xf] %vm20_vm0, %v148_v23  }
  0xa1   :  { %153 = vst.msk [vmem:[#allocation0 + $0x7] ss:$8 sm:$0xf0] %vm20_vm0, %v148_v23  }
  0xa2   :  { %171 = dma.vmem_to_hbm [thread:$0]  %s167_s21, 2048, %s169_s1, [#allocation1]  }
  0xa3   :  { %210 = dma.done.wait [#allocation1], 2048  }
  0xa4   :  { %211 = vsyncadd [#allocation1], 4294965248 }
  0xa5   :  { %174 = vsyncpa [#allocation1], 1 }

// kernel: cor_vae_conv_forward.5
= control target key start
LH: loop header
LB: loop body
LE: loop exit
PB: predicated region body
PF: predicated region fallthrough
CT: control target
= control target key end

     0   :  { %s727_s12 = smov 0   ;;  %s729_s13 = smov 0   ;;  %s852_s0 = inlined_call_operand.vmem [shape: bf16[2,8,80], index: 0, kind: input, shape index: {}]   ;;  %s853_s1 = inlined_call_operand.vmem [shape: bf16[2,80,512], index: 1, kind: input, shape index: {}]   ;;  %s854_s2 = inlined_call_operand.vmem [shape: f32[2,8,1], index: 2, kind: input, shape index: {}]   ;;  %s855_s3 = inlined_call_operand.vmem [shape: f32[2,2,8,256], index: 3, kind: output, shape index: {}]  }
   0x1   :  { %s731_s14 = smov 0   ;;  %s733_s15 = smov 0  }
   0x2   :  { %s735_s16 = smov 0   ;;  %s737_s17 = smov 0  }
   0x3   :  { %s739_s18 = smov 0  }
   0x4 LB: > { %s22_s19 = sadd.s32 1, %s696_s16  ;;  %s25_s20 = sadd.s32 1, %s700_s17  ;;  %s704_s18 = sphi %s739_s18, %s13_s18   ;;  %s700_s17 = sphi %s737_s17, %s861_s17   ;;  %s696_s16 = sphi %s735_s16, %s860_s16   ;;  %s692_s15 = sphi %s733_s15, %s859_s15   ;;  %s688_s14 = sphi %s731_s14, %s858_s14   ;;  %s684_s13 = sphi %s729_s13, %s857_s13   ;;  %s680_s12 = sphi %s727_s12, %s856_s12  }
   0x5   : > { %p23_p0 = scmp.ge.s32.totalorder %s22_s19, 2  ;;  %p67_p1 = scmp.ne.s32.totalorder %s684_s13, %s680_s12 }
   0x6   : > { %p68_p2 = scmp.eq.s32.totalorder %s704_s18, 0  ;;  %s60_s24 = sadd.s32 1, %s684_s13 }
   0x7   : > { %s863_s19 = smov (%p23_p0, %s22_s19), 0  ;;  %s865_s20 = smov (!%p23_p0, %s25_s20), %s700_s17 }
   0x8   : > { %p69_p3 = por %p68_p2, %p67_p1  ;;  %p27_p4 = scmp.ge.s32.totalorder %s865_s20, 2 }
   0x9   : > { %s56_s21 = ssub.s32 %s696_s16, %s863_s19  ;;  %p526_p6 = scmp.ge.s32.totalorder %s704_s18, 4 }
   0xa   : > { %s867_s20 = smov (%p27_p4, %s865_s20), 0 }
   0xb   : > { %s55_s22 = ssub.s32 %s700_s17, %s867_s20  ;;  %147 = sbr.rel (%p526_p6) target bundleno = 34 (0x22), region = 16 }
   0xc   : > { %s57_s23 = sor.u32 %s56_s21, %s55_s22 }
   0xd   : > { %p58_p5 = scmp.eq.s32.totalorder %s57_s23, 0 }
   0xf   : > { %s778_s25 = scalar_select %p58_p5, %s684_s13, %s60_s24  }
  0x10   : > { %157 = sbr.rel (!%p69_p3) target bundleno = 34 (0x22), region = 24  ;;  %s159_s26 = sand.u32 (%p69_p3), 1, %s684_s13  }
  0x11   : > { %s589_s27 = smul.u32 (%p69_p3), 80, %s159_s26  ;;  %s527_s28 = sshll.u32 (%p69_p3), %s696_s16, 1 }
  0x12   : > { %s590_s29 = smul.u32 (%p69_p3), 40, %s700_s17 }
  0x13   : > { %s161_s8 = scalar_lea.vmem (%p69_p3), [#allocation2], %s589_s27 }
  0x14   : > { %s164_s30 = sadd.s32 (%p69_p3), %s590_s29, %s527_s28 }
  0x15   : > { %s528_s4 = sshll.u32 %s164_s30, 2 }
  0x16   : > { %s166_s7 = scalar_lea.vmem %s853_s1, %s528_s4 }
  0x17   : > { %v213_v0 = vld [vmem:[%s166_s7] sm:$0xff]  ;;  %v215_v1 = vld [vmem:[%s166_s7 + $0x10] sm:$0xff] }
  0x18   : > { %v217_v2 = vld [vmem:[%s166_s7 + $0x20] sm:$0xff]  ;;  %214 = vst [vmem:[%s161_s8] sm:$0xff] %v213_v0  ;;  %v219_v3 = vld [vmem:[%s166_s7 + $0x30] sm:$0xff] }
  0x19   : > { %216 = vst [vmem:[%s161_s8 + $0x8] sm:$0xff] %v215_v1  ;;  %v221_v4 = vld [vmem:[%s166_s7 + $0x40] sm:$0xff]  ;;  %v223_v5 = vld [vmem:[%s166_s7 + $0x50] sm:$0xff] }
  0x1a   : > { %218 = vst [vmem:[%s161_s8 + $0x10] sm:$0xff] %v217_v2  ;;  %v225_v6 = vld [vmem:[%s166_s7 + $0x60] sm:$0xff]  ;;  %v227_v7 = vld [vmem:[%s166_s7 + $0x70] sm:$0xff] }
  0x1b   : > { %220 = vst [vmem:[%s161_s8 + $0x18] sm:$0xff] %v219_v3  ;;  %v229_v8 = vld [vmem:[%s166_s7 + $0x80] sm:$0xff]  ;;  %v231_v9 = vld [vmem:[%s166_s7 + $0x90] sm:$0xff] }
  0x1c   : > { %222 = vst [vmem:[%s161_s8 + $0x20] sm:$0xff] %v221_v4 }
  0x1d   : > { %224 = vst [vmem:[%s161_s8 + $0x28] sm:$0xff] %v223_v5 }
  0x1e   : > { %226 = vst [vmem:[%s161_s8 + $0x30] sm:$0xff] %v225_v6 }
  0x1f   : > { %228 = vst [vmem:[%s161_s8 + $0x38] sm:$0xff] %v227_v7 }
  0x20   : > { %230 = vst [vmem:[%s161_s8 + $0x40] sm:$0xff] %v229_v8 }
  0x21   : > { %232 = vst [vmem:[%s161_s8 + $0x48] sm:$0xff] %v231_v9 }
  0x22 PF: > { %p529_p7 = scmp.ge.s32.totalorder %s704_s18, 1  ;;  %p244_p8 = scmp.lt.s32.totalorder %s704_s18, 5 }
  0x24   : > { %p245_p9 = pnand %p529_p7, %p244_p8 }
  0x25   : > { %s251_s9 = sand.u32 (!%p245_p9), 1, %s680_s12   ;;  %p286_p10 = scmp.lt.s32.totalorder (!%p245_p9), %s692_s15, 1 }
  0x26   : > { %248 = sbr.rel (%p245_p9) target bundleno = 200 (0xc8), region = 66  ;;  %p297_p11 = scmp.lt.s32.totalorder (!%p245_p9), %s688_s14, 1 }
  0x27   : > { %s591_s10 = smul.u32 (!%p245_p9), 80, %s251_s9 }
  0x29   : > { %s791_s11 = scalar_lea.vmem (!%p245_p9), [#allocation2], %s591_s10 }
  0x2b   : > { %v706_v10 = vmov 0   ;;  %v569_v11 = vld [vmem:[%s791_s11 + $0x40] sm:$0xf]  ;;  %v588_v12 = vld [vmem:[%s791_s11 + $0x44] sm:$0xf0]  ;;  %s869_s15 = smov (!%p286_p10, %s692_s15), 1 }
  0x2c   : > { %649 = vset.pattern.permute.xlu0 %v706_v10  ;;  %v587_v13 = vld [vmem:[%s791_s11 + $0x44] sm:$0xf]  ;;  %v570_v14 = vor.u32 %v588_v12, %v569_v11  ;;  %v571_v15 = vld [vmem:[%s791_s11 + $0x48] sm:$0xf0]  ;;  %v561_v16 = vld [vmem:[%s791_s11 + $0x30] sm:$0xf] }
  0x2d   : > { %v586_v17 = vld [vmem:[%s791_s11 + $0x34] sm:$0xf0]  ;;  %v574_v18 = vor.u32 %v587_v13, %v571_v15  ;;  %v585_v19 = vld [vmem:[%s791_s11 + $0x34] sm:$0xf]  ;;  %v563_v20 = vld [vmem:[%s791_s11 + $0x38] sm:$0xf0] }
  0x2e   : > { %379 = vmatpush.bf16.msra.mxu0 %v570_v14  ;;  %v562_v21 = vor.u32 %v586_v17, %v561_v16  ;;  %v566_v22 = vor.u32 %v585_v19, %v563_v20  ;;  %v553_v23 = vld [vmem:[%s791_s11 + $0x20] sm:$0xf]  ;;  %v584_v24 = vld [vmem:[%s791_s11 + $0x24] sm:$0xf0]  ;;  %v583_v25 = vld [vmem:[%s791_s11 + $0x24] sm:$0xf] }
  0x2f   : > { %392 = vmatpush.bf16.msra.mxu1 %v574_v18  ;;  %v555_v26 = vld [vmem:[%s791_s11 + $0x28] sm:$0xf0]  ;;  %s531_s12 = sshll.u32 %s869_s15, 3  ;;  %v554_v27 = vor.u32 %v584_v24, %v553_v23  ;;  %v545_v29 = vld [vmem:[%s791_s11 + $0x10] sm:$0xf]  ;;  %s530_s24 = sshll.u32 %s869_s15, 2 }
  0x30   : > { %s294_s23 = scalar_lea.vmem %s854_s2, %s531_s12  ;;  %v558_v28 = vor.u32 %v583_v25, %v555_v26  ;;  %v582_v30 = vld [vmem:[%s791_s11 + $0x14] sm:$0xf0]  ;;  %v581_v32 = vld [vmem:[%s791_s11 + $0x14] sm:$0xf]  ;;  %v547_v33 = vld [vmem:[%s791_s11 + $0x18] sm:$0xf0]  ;;  %s289_s28 = scalar_lea.vmem %s852_s0, %s530_s24 }
  0x31   : > { %v316_v31 = vld [vmem:[%s294_s23] sm:$0xff]  ;;  %v546_v34 = vor.u32 %v582_v30, %v545_v29  ;;  %v550_v35 = vor.u32 %v581_v32, %v547_v33  ;;  %v580_v37 = vld [vmem:[%s791_s11 + $0x4] sm:$0xf0]  ;;  %v539_v39 = vld [vmem:[%s791_s11 + $0x8] sm:$0xf0]  ;;  %vm372_vm0 = vcmask 654336  }
  0x32   : > { %380 = vmatpush.bf16.msra.mxu0 %v562_v21  ;;  %319 = vperm.xlu0 %649, %v316_v31   ;;  %v537_v36 = vld [vmem:[%s791_s11] sm:$0xf]  ;;  %v579_v38 = vld [vmem:[%s791_s11 + $0x4] sm:$0xf]  ;;  %s871_s14 = smov (!%p297_p11, %s688_s14), 1 }
  0x33   : > { %393 = vmatpush.bf16.msra.mxu1 %v566_v22  ;;  %v538_v40 = vor.u32 %v580_v37, %v537_v36  ;;  %v542_v41 = vor.u32 %v579_v38, %v539_v39  ;;  %v305_v42 = vld [vmem:[%s289_s28] sm:$0xf]  ;;  %s532_s29 = sshll.u32 %s871_s14, 1 }
  0x34   : > { %s301_s30 = sadd.s32 %s532_s29, %s530_s24 }
  0x35   : > { %s534_s4 = sshll.u32 %s301_s30, 3 }
  0x36   : > { %381 = vmatpush.bf16.msra.mxu0 %v554_v27  ;;  %s303_s6 = scalar_lea.vmem %s855_s3, %s534_s4 }
  0x37   : > { %394 = vmatpush.bf16.msra.mxu1 %v558_v28 }
  0x3a   : > { %382 = vmatpush.bf16.msra.mxu0 %v546_v34 }
  0x3b   : > { %395 = vmatpush.bf16.msra.mxu1 %v550_v35 }
  0x3e   : > { %383 = vmatpush.bf16.msra.mxu0 %v538_v40 }
  0x3f   : > { %396 = vmatpush.bf16.msra.mxu1 %v542_v41 }
  0x41   : > { %575 = vmatmul.msk.bf16.vlgmr.msra.gmra.mxu0 %vm372_vm0, %v305_v42 }
  0x42   : > { %576 = vmatmul.msk.bf16.vlgmr.msra.gmra.mxu1 %vm372_vm0, %v305_v42 }
  0xa4   : > { %v320_v43 = vpop.permute.xlu0 %319 }
  0xbe   : > { %v385_v44 = vpop.f32.mrf.mxu0 }
  0xbf   : > { %v386_v45 = vadd.f32 %v385_v44, %v320_v43  ;;  %v398_v46 = vpop.f32.mrf.mxu1 }
  0xc0   : > { %v399_v47 = vadd.f32 %v398_v46, %v320_v43 }
  0xc1   : > { %402 = vst [vmem:[%s303_s6] sm:$0xff] %v386_v45 }
  0xc2   : > { %403 = vst [vmem:[%s303_s6 + $0x8] sm:$0xff] %v399_v47 }
  0xc6   : > { %v387_v48 = vpop.f32.mrf.mxu0 }
  0xc7   : > { %v400_v49 = vpop.f32.mrf.mxu1 }
  0xc8 PF: > { %s13_s18 = sadd.s32 1, %s704_s18   ;;  %s856_s12 = smov %s684_s13 }
  0xc9   : > { %p10_p12 = scmp.ge.s32.totalorder %s13_s18, 6   ;;  %s857_s13 = smov %s778_s25 }
  0xca   : > { %s858_s14 = smov %s696_s16  ;;  %s859_s15 = smov %s700_s17 }
  0xcb   : > { %s860_s16 = smov %s863_s19  ;;  %s861_s17 = smov %s867_s20 }
  0xcc   :  { %12 = sbr.rel (!%p10_p12) target bundleno = 4 (0x4), region = 111 }

</bundles_post_ra>
